<compile_context>
chip_gen: v7x
topology: tpu7x:2x2x1
jax: 0.10.0
libtpu: 0.0.40
codegen_flags: <defaults>
</compile_context>

<pallas_src>
import jax
import jax.numpy as jnp
from jax.experimental import pallas as pl
from jax.experimental.pallas import tpu as pltpu


def conv3x3_shuffle_kernel(xq_ref, w_ref, b_ref, o_ref):
    """Fused 3x3 conv (1 -> 4 ch) + PixelShuffle(2) for one (batch, row-tile).

    xq_ref: (1, H+2, 2W+4) VMEM  reflect-padded, column-doubled input
                                 (resident per batch element).
    w_ref : (2, 3, 3, 2W)  VMEM  lane-periodic weights:
                                 w_ref[i, ki, kj, 2w+j] = W[2i+j, 0, ki, kj]
    b_ref : (2, 2W)        VMEM  lane-periodic bias: b_ref[i, 2w+j] = b[2i+j]
    o_ref : (1, TH, 2, 2W) VMEM  output rows 2*(t*TH+h)+i, already shuffled.
    """
    t = pl.program_id(1)
    TH = o_ref.shape[1]
    W2 = o_ref.shape[3]  # = 2W

    # Load the (TH+2)-row halo window once; all 9 taps and both row parities
    # reuse it (taps hoisted out of the channel loop).
    r0 = pl.multiple_of(t * TH, TH)
    xq = xq_ref[0, pl.ds(r0, TH + 2), :]                     # (TH+2, 2W+4)
    taps = [[xq[ki:ki + TH, 2 * kj:2 * kj + W2] for kj in range(3)]
            for ki in range(3)]                              # 9 x (TH, 2W)

    for i in range(2):  # output row parity
        acc = taps[0][0] * w_ref[i, 0, 0, :]                 # init with first tap
        for ki in range(3):
            for kj in range(3):
                if ki == 0 and kj == 0:
                    continue
                acc = acc + taps[ki][kj] * w_ref[i, ki, kj, :]
        # Lane-dense store: minor dim is the full 2W output width.
        o_ref[0, :, i, :] = acc + b_ref[i, :]


def _pick_row_tile(H):
    for th in (128, 64, 32, 16, 8):
        if H % th == 0:
            return th
    return H  # fallback: single row tile


def upsample_rcp(x, weight, bias, *, row_tile=None):
    """Forward pass of Upsample_RCP.

    x      : (N, 1, H, W) float32  (NCHW, like PyTorch)
    weight : (4, 1, 3, 3) float32  (Conv2d weight)
    bias   : (4,)         float32  (Conv2d bias)
    returns: (N, 1, 2H, 2W) float32
    """
    N, C, H, W = x.shape
    assert C == 1, "Upsample_RCP conv has 1 input channel"
    assert H >= 2 and W >= 2, "reflect padding needs H, W >= 2"

    TH = row_tile if row_tile is not None else _pick_row_tile(H)
    assert H % TH == 0, (H, TH)

    # --- XLA glue: reflect pad + column duplication (single fused pass). ---
    xp = jnp.pad(x[:, 0].astype(jnp.float32), ((0, 0), (1, 1), (1, 1)),
                 mode="reflect")                              # (N, H+2, W+2)
    xq = jnp.repeat(xp, 2, axis=2)                            # (N, H+2, 2W+4)

    # Lane-periodic weight / bias patterns (tiny; built once per call).
    base = weight.astype(jnp.float32)[:, 0].reshape(2, 2, 3, 3)   # [i, j, ki, kj]
    wpat = jnp.tile(base.transpose(0, 2, 3, 1)[:, :, :, None, :],
                    (1, 1, 1, W, 1)).reshape(2, 3, 3, 2 * W)      # [i,ki,kj,2w+j]
    bpat = jnp.tile(bias.astype(jnp.float32).reshape(2, 1, 2),
                    (1, W, 1)).reshape(2, 2 * W)                  # [i, 2w+j]

    y = pl.pallas_call(
        conv3x3_shuffle_kernel,
        out_shape=jax.ShapeDtypeStruct((N, H, 2, 2 * W), jnp.float32),
        grid_spec=pltpu.PrefetchScalarGridSpec(
            num_scalar_prefetch=0,
            grid=(N, H // TH),
            in_specs=[
                # Padded+doubled input: resident per batch element (same block
                # across the row-tile axis); kernel slices its halo window.
                pl.BlockSpec((1, H + 2, 2 * W + 4), lambda n, t: (n, 0, 0)),
                pl.BlockSpec((2, 3, 3, 2 * W), lambda n, t: (0, 0, 0, 0)),
                pl.BlockSpec((2, 2 * W), lambda n, t: (0, 0)),
            ],
            out_specs=pl.BlockSpec((1, TH, 2, 2 * W), lambda n, t: (n, t, 0, 0)),
        ),
        compiler_params=pltpu.CompilerParams(
            dimension_semantics=("parallel", "parallel"),
            vmem_limit_bytes=32 * 1024 * 1024,
        ),
    )(xq, wpat, bpat)

    # Free reshape: (N, H, 2, 2W) row-major == (N, 1, 2H, 2W).
    return y.reshape(N, 1, 2 * H, 2 * W)


def _reference_forward(x, weight, bias):
    """Pure-JAX reference (no Pallas) for correctness check."""
    N, _, H, W = x.shape
    xp = jnp.pad(x[:, 0], ((0, 0), (1, 1), (1, 1)), mode="reflect")
    conv = jnp.zeros((N, 4, H, W), jnp.float32)
    for c in range(4):
        acc = jnp.full((N, H, W), bias[c], dtype=jnp.float32)
        for ki in range(3):
            for kj in range(3):
                acc = acc + xp[:, ki:ki + H, kj:kj + W] * weight[c, 0, ki, kj]
        conv = conv.at[:, c].set(acc)
    out = (
        conv.reshape(N, 1, 2, 2, H, W)
        .transpose(0, 1, 4, 2, 5, 3)
        .reshape(N, 1, 2 * H, 2 * W)
    )
    return out


if __name__ == "__main__":
    key = jax.random.PRNGKey(0)
    k_x, k_w, k_b = jax.random.split(key, 3)

    N, H, W = 2, 16, 16
    x = jax.random.normal(k_x, (N, 1, H, W), dtype=jnp.float32)

    # Deterministic synthetic params (Conv2d(1, 4, 3): weight (4,1,3,3), bias (4,))
    fan_in = 1 * 3 * 3
    bound = 1.0 / jnp.sqrt(fan_in)
    weight = jax.random.uniform(k_w, (4, 1, 3, 3), jnp.float32, -bound, bound)
    bias = jax.random.uniform(k_b, (4,), jnp.float32, -bound, bound)

    fwd = jax.jit(upsample_rcp, static_argnames=("row_tile",))
    # row_tile=8 -> grid (N, 2): exercises the multi-row-tile (halo) path.
    out = jax.block_until_ready(fwd(x, weight, bias, row_tile=8))

    ref = _reference_forward(x, weight, bias)
    assert out.shape == (N, 1, 2 * H, 2 * W), out.shape
    assert jnp.allclose(out, ref, atol=1e-5, rtol=1e-5), "mismatch vs reference"

    print("KERNEL_OK")
</pallas_src>

<mosaic_0001>
module attributes {stable_mosaic.version = 11 : i64} {
  func.func @conv3x3_shuffle_kernel(%arg0: i32, %arg1: i32, %arg2: memref<1x18x36xf32, #tpu.memory_space<vmem>>, %arg3: memref<2x3x3x32xf32, #tpu.memory_space<vmem>>, %arg4: memref<2x32xf32, #tpu.memory_space<vmem>>, %arg5: memref<1x8x2x32xf32, #tpu.memory_space<vmem>>) attributes {dimension_semantics = [#tpu.dimension_semantics<parallel>, #tpu.dimension_semantics<parallel>], iteration_bounds = array<i64: 2, 2>, scalar_prefetch = 0 : i64, scratch_operands = 0 : i64, tpu.core_type = #tpu.core_type<tc>, window_params = [{transform_indices = @transform_0, window_bounds = array<i64: 1, 18, 36>}, {pipeline_mode = #tpu.pipeline_mode<synchronous>, transform_indices = @transform_1, window_bounds = array<i64: 2, 3, 3, 32>}, {pipeline_mode = #tpu.pipeline_mode<synchronous>, transform_indices = @transform_2, window_bounds = array<i64: 2, 32>}, {transform_indices = @transform_3, window_bounds = array<i64: 1, 8, 2, 32>}]} {
    %c8_i32 = arith.constant 8 : i32
    %0 = arith.muli %arg1, %c8_i32 : i32
    %1 = tpu.assume_multiple %0, 8 : i32
    %c0 = arith.constant 0 : index
    %2 = arith.index_cast %1 : i32 to index
    %c0_0 = arith.constant 0 : index
    %3 = vector.load %arg2[%c0, %2, %c0_0] : memref<1x18x36xf32, #tpu.memory_space<vmem>>, vector<1x10x36xf32>
    %4 = vector.shape_cast %3 : vector<1x10x36xf32> to vector<10x36xf32>
    %5 = vector.extract_strided_slice %4 {offsets = [0, 0], sizes = [8, 32], strides = [1, 1]} : vector<10x36xf32> to vector<8x32xf32>
    %6 = vector.extract_strided_slice %4 {offsets = [0, 2], sizes = [8, 32], strides = [1, 1]} : vector<10x36xf32> to vector<8x32xf32>
    %7 = vector.extract_strided_slice %4 {offsets = [0, 4], sizes = [8, 32], strides = [1, 1]} : vector<10x36xf32> to vector<8x32xf32>
    %8 = vector.extract_strided_slice %4 {offsets = [1, 0], sizes = [8, 32], strides = [1, 1]} : vector<10x36xf32> to vector<8x32xf32>
    %9 = vector.extract_strided_slice %4 {offsets = [1, 2], sizes = [8, 32], strides = [1, 1]} : vector<10x36xf32> to vector<8x32xf32>
    %10 = vector.extract_strided_slice %4 {offsets = [1, 4], sizes = [8, 32], strides = [1, 1]} : vector<10x36xf32> to vector<8x32xf32>
    %11 = vector.extract_strided_slice %4 {offsets = [2, 0], sizes = [8, 32], strides = [1, 1]} : vector<10x36xf32> to vector<8x32xf32>
    %12 = vector.extract_strided_slice %4 {offsets = [2, 2], sizes = [8, 32], strides = [1, 1]} : vector<10x36xf32> to vector<8x32xf32>
    %13 = vector.extract_strided_slice %4 {offsets = [2, 4], sizes = [8, 32], strides = [1, 1]} : vector<10x36xf32> to vector<8x32xf32>
    %c0_1 = arith.constant 0 : index
    %c0_2 = arith.constant 0 : index
    %c0_3 = arith.constant 0 : index
    %c0_4 = arith.constant 0 : index
    %14 = vector.load %arg3[%c0_1, %c0_2, %c0_3, %c0_4] : memref<2x3x3x32xf32, #tpu.memory_space<vmem>>, vector<1x1x1x32xf32>
    %15 = vector.shape_cast %14 : vector<1x1x1x32xf32> to vector<32xf32>
    %16 = vector.shape_cast %15 : vector<32xf32> to vector<1x32xf32>
    %17 = vector.broadcast %16 : vector<1x32xf32> to vector<8x32xf32>
    %18 = arith.mulf %5, %17 : vector<8x32xf32>
    %c0_5 = arith.constant 0 : index
    %c0_6 = arith.constant 0 : index
    %c1 = arith.constant 1 : index
    %c0_7 = arith.constant 0 : index
    %19 = vector.load %arg3[%c0_5, %c0_6, %c1, %c0_7] : memref<2x3x3x32xf32, #tpu.memory_space<vmem>>, vector<1x1x1x32xf32>
    %20 = vector.shape_cast %19 : vector<1x1x1x32xf32> to vector<32xf32>
    %21 = vector.shape_cast %20 : vector<32xf32> to vector<1x32xf32>
    %22 = vector.broadcast %21 : vector<1x32xf32> to vector<8x32xf32>
    %23 = arith.mulf %6, %22 : vector<8x32xf32>
    %24 = arith.addf %18, %23 : vector<8x32xf32>
    %c0_8 = arith.constant 0 : index
    %c0_9 = arith.constant 0 : index
    %c2 = arith.constant 2 : index
    %c0_10 = arith.constant 0 : index
    %25 = vector.load %arg3[%c0_8, %c0_9, %c2, %c0_10] : memref<2x3x3x32xf32, #tpu.memory_space<vmem>>, vector<1x1x1x32xf32>
    %26 = vector.shape_cast %25 : vector<1x1x1x32xf32> to vector<32xf32>
    %27 = vector.shape_cast %26 : vector<32xf32> to vector<1x32xf32>
    %28 = vector.broadcast %27 : vector<1x32xf32> to vector<8x32xf32>
    %29 = arith.mulf %7, %28 : vector<8x32xf32>
    %30 = arith.addf %24, %29 : vector<8x32xf32>
    %c0_11 = arith.constant 0 : index
    %c1_12 = arith.constant 1 : index
    %c0_13 = arith.constant 0 : index
    %c0_14 = arith.constant 0 : index
    %31 = vector.load %arg3[%c0_11, %c1_12, %c0_13, %c0_14] : memref<2x3x3x32xf32, #tpu.memory_space<vmem>>, vector<1x1x1x32xf32>
    %32 = vector.shape_cast %31 : vector<1x1x1x32xf32> to vector<32xf32>
    %33 = vector.shape_cast %32 : vector<32xf32> to vector<1x32xf32>
    %34 = vector.broadcast %33 : vector<1x32xf32> to vector<8x32xf32>
    %35 = arith.mulf %8, %34 : vector<8x32xf32>
    %36 = arith.addf %30, %35 : vector<8x32xf32>
    %c0_15 = arith.constant 0 : index
    %c1_16 = arith.constant 1 : index
    %c1_17 = arith.constant 1 : index
    %c0_18 = arith.constant 0 : index
    %37 = vector.load %arg3[%c0_15, %c1_16, %c1_17, %c0_18] : memref<2x3x3x32xf32, #tpu.memory_space<vmem>>, vector<1x1x1x32xf32>
    %38 = vector.shape_cast %37 : vector<1x1x1x32xf32> to vector<32xf32>
    %39 = vector.shape_cast %38 : vector<32xf32> to vector<1x32xf32>
    %40 = vector.broadcast %39 : vector<1x32xf32> to vector<8x32xf32>
    %41 = arith.mulf %9, %40 : vector<8x32xf32>
    %42 = arith.addf %36, %41 : vector<8x32xf32>
    %c0_19 = arith.constant 0 : index
    %c1_20 = arith.constant 1 : index
    %c2_21 = arith.constant 2 : index
    %c0_22 = arith.constant 0 : index
    %43 = vector.load %arg3[%c0_19, %c1_20, %c2_21, %c0_22] : memref<2x3x3x32xf32, #tpu.memory_space<vmem>>, vector<1x1x1x32xf32>
    %44 = vector.shape_cast %43 : vector<1x1x1x32xf32> to vector<32xf32>
    %45 = vector.shape_cast %44 : vector<32xf32> to vector<1x32xf32>
    %46 = vector.broadcast %45 : vector<1x32xf32> to vector<8x32xf32>
    %47 = arith.mulf %10, %46 : vector<8x32xf32>
    %48 = arith.addf %42, %47 : vector<8x32xf32>
    %c0_23 = arith.constant 0 : index
    %c2_24 = arith.constant 2 : index
    %c0_25 = arith.constant 0 : index
    %c0_26 = arith.constant 0 : index
    %49 = vector.load %arg3[%c0_23, %c2_24, %c0_25, %c0_26] : memref<2x3x3x32xf32, #tpu.memory_space<vmem>>, vector<1x1x1x32xf32>
    %50 = vector.shape_cast %49 : vector<1x1x1x32xf32> to vector<32xf32>
    %51 = vector.shape_cast %50 : vector<32xf32> to vector<1x32xf32>
    %52 = vector.broadcast %51 : vector<1x32xf32> to vector<8x32xf32>
    %53 = arith.mulf %11, %52 : vector<8x32xf32>
    %54 = arith.addf %48, %53 : vector<8x32xf32>
    %c0_27 = arith.constant 0 : index
    %c2_28 = arith.constant 2 : index
    %c1_29 = arith.constant 1 : index
    %c0_30 = arith.constant 0 : index
    %55 = vector.load %arg3[%c0_27, %c2_28, %c1_29, %c0_30] : memref<2x3x3x32xf32, #tpu.memory_space<vmem>>, vector<1x1x1x32xf32>
    %56 = vector.shape_cast %55 : vector<1x1x1x32xf32> to vector<32xf32>
    %57 = vector.shape_cast %56 : vector<32xf32> to vector<1x32xf32>
    %58 = vector.broadcast %57 : vector<1x32xf32> to vector<8x32xf32>
    %59 = arith.mulf %12, %58 : vector<8x32xf32>
    %60 = arith.addf %54, %59 : vector<8x32xf32>
    %c0_31 = arith.constant 0 : index
    %c2_32 = arith.constant 2 : index
    %c2_33 = arith.constant 2 : index
    %c0_34 = arith.constant 0 : index
    %61 = vector.load %arg3[%c0_31, %c2_32, %c2_33, %c0_34] : memref<2x3x3x32xf32, #tpu.memory_space<vmem>>, vector<1x1x1x32xf32>
    %62 = vector.shape_cast %61 : vector<1x1x1x32xf32> to vector<32xf32>
    %63 = vector.shape_cast %62 : vector<32xf32> to vector<1x32xf32>
    %64 = vector.broadcast %63 : vector<1x32xf32> to vector<8x32xf32>
    %65 = arith.mulf %13, %64 : vector<8x32xf32>
    %66 = arith.addf %60, %65 : vector<8x32xf32>
    %c0_35 = arith.constant 0 : index
    %c0_36 = arith.constant 0 : index
    %67 = vector.load %arg4[%c0_35, %c0_36] : memref<2x32xf32, #tpu.memory_space<vmem>>, vector<1x32xf32>
    %68 = vector.shape_cast %67 : vector<1x32xf32> to vector<32xf32>
    %69 = vector.shape_cast %68 : vector<32xf32> to vector<1x32xf32>
    %70 = vector.broadcast %69 : vector<1x32xf32> to vector<8x32xf32>
    %71 = arith.addf %66, %70 : vector<8x32xf32>
    %c0_37 = arith.constant 0 : index
    %c0_38 = arith.constant 0 : index
    %c0_39 = arith.constant 0 : index
    %c0_40 = arith.constant 0 : index
    %72 = vector.load %arg5[%c0_37, %c0_38, %c0_39, %c0_40] : memref<1x8x2x32xf32, #tpu.memory_space<vmem>>, vector<1x8x1x32xf32>
    %73 = vector.shape_cast %72 : vector<1x8x1x32xf32> to vector<8x32xf32>
    %74 = vector.shape_cast %71 : vector<8x32xf32> to vector<1x8x1x32xf32>
    tpu.vector_store %arg5[%c0_37, %c0_38, %c0_39, %c0_40], %74 {strides = array<i32>} : memref<1x8x2x32xf32, #tpu.memory_space<vmem>>, vector<1x8x1x32xf32>,
    %c1_41 = arith.constant 1 : index
    %c0_42 = arith.constant 0 : index
    %c0_43 = arith.constant 0 : index
    %c0_44 = arith.constant 0 : index
    %75 = vector.load %arg3[%c1_41, %c0_42, %c0_43, %c0_44] : memref<2x3x3x32xf32, #tpu.memory_space<vmem>>, vector<1x1x1x32xf32>
    %76 = vector.shape_cast %75 : vector<1x1x1x32xf32> to vector<32xf32>
    %77 = vector.shape_cast %76 : vector<32xf32> to vector<1x32xf32>
    %78 = vector.broadcast %77 : vector<1x32xf32> to vector<8x32xf32>
    %79 = arith.mulf %5, %78 : vector<8x32xf32>
    %c1_45 = arith.constant 1 : index
    %c0_46 = arith.constant 0 : index
    %c1_47 = arith.constant 1 : index
    %c0_48 = arith.constant 0 : index
    %80 = vector.load %arg3[%c1_45, %c0_46, %c1_47, %c0_48] : memref<2x3x3x32xf32, #tpu.memory_space<vmem>>, vector<1x1x1x32xf32>
    %81 = vector.shape_cast %80 : vector<1x1x1x32xf32> to vector<32xf32>
    %82 = vector.shape_cast %81 : vector<32xf32> to vector<1x32xf32>
    %83 = vector.broadcast %82 : vector<1x32xf32> to vector<8x32xf32>
    %84 = arith.mulf %6, %83 : vector<8x32xf32>
    %85 = arith.addf %79, %84 : vector<8x32xf32>
    %c1_49 = arith.constant 1 : index
    %c0_50 = arith.constant 0 : index
    %c2_51 = arith.constant 2 : index
    %c0_52 = arith.constant 0 : index
    %86 = vector.load %arg3[%c1_49, %c0_50, %c2_51, %c0_52] : memref<2x3x3x32xf32, #tpu.memory_space<vmem>>, vector<1x1x1x32xf32>
    %87 = vector.shape_cast %86 : vector<1x1x1x32xf32> to vector<32xf32>
    %88 = vector.shape_cast %87 : vector<32xf32> to vector<1x32xf32>
    %89 = vector.broadcast %88 : vector<1x32xf32> to vector<8x32xf32>
    %90 = arith.mulf %7, %89 : vector<8x32xf32>
    %91 = arith.addf %85, %90 : vector<8x32xf32>
    %c1_53 = arith.constant 1 : index
    %c1_54 = arith.constant 1 : index
    %c0_55 = arith.constant 0 : index
    %c0_56 = arith.constant 0 : index
    %92 = vector.load %arg3[%c1_53, %c1_54, %c0_55, %c0_56] : memref<2x3x3x32xf32, #tpu.memory_space<vmem>>, vector<1x1x1x32xf32>
    %93 = vector.shape_cast %92 : vector<1x1x1x32xf32> to vector<32xf32>
    %94 = vector.shape_cast %93 : vector<32xf32> to vector<1x32xf32>
    %95 = vector.broadcast %94 : vector<1x32xf32> to vector<8x32xf32>
    %96 = arith.mulf %8, %95 : vector<8x32xf32>
    %97 = arith.addf %91, %96 : vector<8x32xf32>
    %c1_57 = arith.constant 1 : index
    %c1_58 = arith.constant 1 : index
    %c1_59 = arith.constant 1 : index
    %c0_60 = arith.constant 0 : index
    %98 = vector.load %arg3[%c1_57, %c1_58, %c1_59, %c0_60] : memref<2x3x3x32xf32, #tpu.memory_space<vmem>>, vector<1x1x1x32xf32>
    %99 = vector.shape_cast %98 : vector<1x1x1x32xf32> to vector<32xf32>
    %100 = vector.shape_cast %99 : vector<32xf32> to vector<1x32xf32>
    %101 = vector.broadcast %100 : vector<1x32xf32> to vector<8x32xf32>
    %102 = arith.mulf %9, %101 : vector<8x32xf32>
    %103 = arith.addf %97, %102 : vector<8x32xf32>
    %c1_61 = arith.constant 1 : index
    %c1_62 = arith.constant 1 : index
    %c2_63 = arith.constant 2 : index
    %c0_64 = arith.constant 0 : index
    %104 = vector.load %arg3[%c1_61, %c1_62, %c2_63, %c0_64] : memref<2x3x3x32xf32, #tpu.memory_space<vmem>>, vector<1x1x1x32xf32>
    %105 = vector.shape_cast %104 : vector<1x1x1x32xf32> to vector<32xf32>
    %106 = vector.shape_cast %105 : vector<32xf32> to vector<1x32xf32>
    %107 = vector.broadcast %106 : vector<1x32xf32> to vector<8x32xf32>
    %108 = arith.mulf %10, %107 : vector<8x32xf32>
    %109 = arith.addf %103, %108 : vector<8x32xf32>
    %c1_65 = arith.constant 1 : index
    %c2_66 = arith.constant 2 : index
    %c0_67 = arith.constant 0 : index
    %c0_68 = arith.constant 0 : index
    %110 = vector.load %arg3[%c1_65, %c2_66, %c0_67, %c0_68] : memref<2x3x3x32xf32, #tpu.memory_space<vmem>>, vector<1x1x1x32xf32>
    %111 = vector.shape_cast %110 : vector<1x1x1x32xf32> to vector<32xf32>
    %112 = vector.shape_cast %111 : vector<32xf32> to vector<1x32xf32>
    %113 = vector.broadcast %112 : vector<1x32xf32> to vector<8x32xf32>
    %114 = arith.mulf %11, %113 : vector<8x32xf32>
    %115 = arith.addf %109, %114 : vector<8x32xf32>
    %c1_69 = arith.constant 1 : index
    %c2_70 = arith.constant 2 : index
    %c1_71 = arith.constant 1 : index
    %c0_72 = arith.constant 0 : index
    %116 = vector.load %arg3[%c1_69, %c2_70, %c1_71, %c0_72] : memref<2x3x3x32xf32, #tpu.memory_space<vmem>>, vector<1x1x1x32xf32>
    %117 = vector.shape_cast %116 : vector<1x1x1x32xf32> to vector<32xf32>
    %118 = vector.shape_cast %117 : vector<32xf32> to vector<1x32xf32>
    %119 = vector.broadcast %118 : vector<1x32xf32> to vector<8x32xf32>
    %120 = arith.mulf %12, %119 : vector<8x32xf32>
    %121 = arith.addf %115, %120 : vector<8x32xf32>
    %c1_73 = arith.constant 1 : index
    %c2_74 = arith.constant 2 : index
    %c2_75 = arith.constant 2 : index
    %c0_76 = arith.constant 0 : index
    %122 = vector.load %arg3[%c1_73, %c2_74, %c2_75, %c0_76] : memref<2x3x3x32xf32, #tpu.memory_space<vmem>>, vector<1x1x1x32xf32>
    %123 = vector.shape_cast %122 : vector<1x1x1x32xf32> to vector<32xf32>
    %124 = vector.shape_cast %123 : vector<32xf32> to vector<1x32xf32>
    %125 = vector.broadcast %124 : vector<1x32xf32> to vector<8x32xf32>
    %126 = arith.mulf %13, %125 : vector<8x32xf32>
    %127 = arith.addf %121, %126 : vector<8x32xf32>
    %c1_77 = arith.constant 1 : index
    %c0_78 = arith.constant 0 : index
    %128 = vector.load %arg4[%c1_77, %c0_78] : memref<2x32xf32, #tpu.memory_space<vmem>>, vector<1x32xf32>
    %129 = vector.shape_cast %128 : vector<1x32xf32> to vector<32xf32>
    %130 = vector.shape_cast %129 : vector<32xf32> to vector<1x32xf32>
    %131 = vector.broadcast %130 : vector<1x32xf32> to vector<8x32xf32>
    %132 = arith.addf %127, %131 : vector<8x32xf32>
    %c0_79 = arith.constant 0 : index
    %c0_80 = arith.constant 0 : index
    %c1_81 = arith.constant 1 : index
    %c0_82 = arith.constant 0 : index
    %133 = vector.load %arg5[%c0_79, %c0_80, %c1_81, %c0_82] : memref<1x8x2x32xf32, #tpu.memory_space<vmem>>, vector<1x8x1x32xf32>
    %134 = vector.shape_cast %133 : vector<1x8x1x32xf32> to vector<8x32xf32>
    %135 = vector.shape_cast %132 : vector<8x32xf32> to vector<1x8x1x32xf32>
    tpu.vector_store %arg5[%c0_79, %c0_80, %c1_81, %c0_82], %135 {strides = array<i32>} : memref<1x8x2x32xf32, #tpu.memory_space<vmem>>, vector<1x8x1x32xf32>,
    return
  }
  func.func @transform_0(%arg0: i32, %arg1: i32) -> (i32, i32, i32) {
    %c0_i32 = arith.constant 0 : i32
    %c0_i32_0 = arith.constant 0 : i32
    %c0_i32_1 = arith.constant 0 : i32
    return %arg0, %c0_i32, %c0_i32_0 : i32, i32, i32
  }
  func.func @transform_1(%arg0: i32, %arg1: i32) -> (i32, i32, i32, i32) {
    %c0_i32 = arith.constant 0 : i32
    %c0_i32_0 = arith.constant 0 : i32
    %c0_i32_1 = arith.constant 0 : i32
    %c0_i32_2 = arith.constant 0 : i32
    %c0_i32_3 = arith.constant 0 : i32
    return %c0_i32, %c0_i32_0, %c0_i32_1, %c0_i32_2 : i32, i32, i32, i32
  }
  func.func @transform_2(%arg0: i32, %arg1: i32) -> (i32, i32) {
    %c0_i32 = arith.constant 0 : i32
    %c0_i32_0 = arith.constant 0 : i32
    %c0_i32_1 = arith.constant 0 : i32
    return %c0_i32, %c0_i32_0 : i32, i32
  }
  func.func @transform_3(%arg0: i32, %arg1: i32) -> (i32, i32, i32, i32) {
    %c0_i32 = arith.constant 0 : i32
    %c0_i32_0 = arith.constant 0 : i32
    %c0_i32_1 = arith.constant 0 : i32
    return %arg0, %arg1, %c0_i32, %c0_i32_0 : i32, i32, i32, i32
  }
}

</mosaic_0001>

<bundles_post_ra>
// kernel: tile.15
= control target key start
LH: loop header
LB: loop body
LE: loop exit
PB: predicated region body
PF: predicated region fallthrough
CT: control target
= control target key end

     0   :  { %s7_s6 = smov 3  ;;  %s21_s9 = smov 3  ;;  %vm4_vm0 = vcmask 15360   ;;  %vm11_vm1 = vcmask 261360   ;;  %vm18_vm2 = vcmask 244960   ;;  %vm25_vm3 = vcmask 228560   ;;  %s223_s0 = inlined_call_operand.vmem [shape: f32[2,16,1,1,2], index: 0, kind: input, shape index: {}]   ;;  %s224_s1 = inlined_call_operand.vmem [shape: f32[2,32], index: 1, kind: output, shape index: {}]  }
   0x1   :  { %v117_v0 = vld [vmem:[%s223_s0 + $0xf] ss:$16 sm:%s7_s6]   ;;  %s147_s10 = smov 30   ;;  %v119_v1 = vld [vmem:[%s223_s0 + $0xd] ss:$16 sm:%s21_s9]   ;;  %s14_s13 = smov 3 }
   0x2   :  { %9 = vrot.lane.b32.xlu0 %v117_v0, %s147_s10  ;;  %s148_s14 = smov 26   ;;  %v118_v2 = vld [vmem:[%s223_s0 + $0xe] ss:$16 sm:%s14_s13]   ;;  %s28_s17 = smov 3  ;;  %vm32_vm4 = vcmask 212160   ;;  %vm39_vm5 = vcmask 195760  }
   0x3   :  { %23 = vrot.lane.b32.xlu1 %v119_v1, %s148_s14  ;;  %v120_v3 = vld [vmem:[%s223_s0 + $0xc] ss:$16 sm:%s28_s17]   ;;  %s35_s20 = smov 3  ;;  %s42_s21 = smov 3  ;;  %vm46_vm6 = vcmask 179360   ;;  %vm53_vm7 = vcmask 162960  }
   0x4   :  { %s149_s22 = smov 28   ;;  %s150_s23 = smov 24   ;;  %v121_v4 = vld [vmem:[%s223_s0 + $0xb] ss:$16 sm:%s35_s20]   ;;  %v122_v5 = vld [vmem:[%s223_s0 + $0xa] ss:$16 sm:%s42_s21]  }
   0x5   :  { %s49_s28 = smov 3  ;;  %s56_s29 = smov 3  ;;  %vm60_vm8 = vcmask 146560   ;;  %vm67_vm9 = vcmask 130160   ;;  %vm74_vm10 = vcmask 113760   ;;  %vm81_vm11 = vcmask 97360  }
   0x6   :  { %16 = vrot.lane.b32.xlu0 %v118_v2, %s149_s22  ;;  %s151_s30 = smov 22   ;;  %s152_s2 = smov 20   ;;  %v123_v6 = vld [vmem:[%s223_s0 + $0x9] ss:$16 sm:%s49_s28]   ;;  %vm88_vm12 = vcmask 80960   ;;  %vm95_vm13 = vcmask 64560  }
   0x7   :  { %30 = vrot.lane.b32.xlu1 %v120_v3, %s150_s23  ;;  %v124_v7 = vld [vmem:[%s223_s0 + $0x8] ss:$16 sm:%s56_s29]   ;;  %s63_s7 = smov 3  ;;  %s70_s8 = smov 3  ;;  %vm102_vm14 = vcmask 48160   ;;  %vm109_vm15 = vcmask 31760  }
   0x8   :  { %s153_s9 = smov 18   ;;  %s154_s10 = smov 16   ;;  %v125_v8 = vld [vmem:[%s223_s0 + $0x7] ss:$16 sm:%s63_s7]   ;;  %v126_v9 = vld [vmem:[%s223_s0 + $0x6] ss:$16 sm:%s70_s8]  }
   0x9   :  { %s2_s13 = smov 3  ;;  %s77_s16 = smov 3 }
   0xa   :  { %37 = vrot.lane.b32.xlu0 %v121_v4, %s151_s30  ;;  %v3_v10 = vld [vmem:[%s223_s0] ss:$16 sm:%s2_s13]   ;;  %s84_s19 = smov 3  ;;  %s155_s20 = smov 14  }
   0xb   :  { %44 = vrot.lane.b32.xlu1 %v122_v5, %s152_s2  ;;  %5 = vst.msk [vmem:[#allocation0] sm:$0x3] %vm4_vm0, %v3_v10   ;;  %s156_s21 = smov 12   ;;  %v127_v11 = vld [vmem:[%s223_s0 + $0x5] ss:$16 sm:%s77_s16]   ;;  %s91_s26 = smov 3 }
   0xc   :  { %v128_v12 = vld [vmem:[%s223_s0 + $0x4] ss:$16 sm:%s84_s19]   ;;  %s98_s27 = smov 3  ;;  %s157_s28 = smov 10   ;;  %v129_v13 = vld [vmem:[%s223_s0 + $0x3] ss:$16 sm:%s91_s26]  }
   0xd   :  { %s158_s29 = smov 8   ;;  %v130_v14 = vld [vmem:[%s223_s0 + $0x2] ss:$16 sm:%s98_s27]   ;;  %s105_s5 = smov 3 }
   0xe   :  { %51 = vrot.lane.b32.xlu0 %v123_v6, %s153_s9  ;;  %s159_s6 = smov 6   ;;  %s160_s7 = smov 4   ;;  %v131_v15 = vld [vmem:[%s223_s0 + $0x1] ss:$16 sm:%s105_s5]  }
   0xf   :  { %58 = vrot.lane.b32.xlu1 %v124_v7, %s154_s10  ;;  %s161_s0 = smov 2  }
  0x12   :  { %65 = vrot.lane.b32.xlu0 %v125_v8, %s155_s20 }
  0x13   :  { %72 = vrot.lane.b32.xlu1 %v126_v9, %s156_s21 }
  0x16   :  { %79 = vrot.lane.b32.xlu0 %v127_v11, %s157_s28 }
  0x17   :  { %86 = vrot.lane.b32.xlu1 %v128_v12, %s158_s29 }
  0x1a   :  { %93 = vrot.lane.b32.xlu0 %v129_v13, %s159_s6 }
  0x1b   :  { %100 = vrot.lane.b32.xlu1 %v130_v14, %s160_s7 }
  0x1e   :  { %107 = vrot.lane.b32.xlu0 %v131_v15, %s161_s0 }
  0x74   :  { %v10_v16 = vpop.permute.xlu0 %9  }
  0x75   :  { %12 = vst.msk [vmem:[#allocation0] sm:$0x3] %vm11_vm1, %v10_v16   ;;  %v24_v17 = vpop.permute.xlu1 %23  }
  0x78   :  { %v17_v18 = vpop.permute.xlu0 %16  }
  0x79   :  { %19 = vst.msk [vmem:[#allocation0] sm:$0x3] %vm18_vm2, %v17_v18   ;;  %v31_v19 = vpop.permute.xlu1 %30  }
  0x7a   :  { %26 = vst.msk [vmem:[#allocation0] sm:$0x3] %vm25_vm3, %v24_v17  }
  0x7b   :  { %33 = vst.msk [vmem:[#allocation0] sm:$0x3] %vm32_vm4, %v31_v19  }
  0x7c   :  { %v38_v20 = vpop.permute.xlu0 %37  }
  0x7d   :  { %40 = vst.msk [vmem:[#allocation0] sm:$0x3] %vm39_vm5, %v38_v20   ;;  %v45_v21 = vpop.permute.xlu1 %44  }
  0x7e   :  { %47 = vst.msk [vmem:[#allocation0] sm:$0x3] %vm46_vm6, %v45_v21  }
  0x80   :  { %v52_v22 = vpop.permute.xlu0 %51  }
  0x81   :  { %54 = vst.msk [vmem:[#allocation0] sm:$0x3] %vm53_vm7, %v52_v22   ;;  %v59_v23 = vpop.permute.xlu1 %58  }
  0x82   :  { %61 = vst.msk [vmem:[#allocation0] sm:$0x3] %vm60_vm8, %v59_v23  }
  0x84   :  { %v66_v24 = vpop.permute.xlu0 %65  }
  0x85   :  { %68 = vst.msk [vmem:[#allocation0] sm:$0x3] %vm67_vm9, %v66_v24   ;;  %v73_v25 = vpop.permute.xlu1 %72  }
  0x86   :  { %75 = vst.msk [vmem:[#allocation0] sm:$0x3] %vm74_vm10, %v73_v25  }
  0x88   :  { %v80_v26 = vpop.permute.xlu0 %79  }
  0x89   :  { %82 = vst.msk [vmem:[#allocation0] sm:$0x3] %vm81_vm11, %v80_v26   ;;  %v87_v27 = vpop.permute.xlu1 %86  }
  0x8a   :  { %89 = vst.msk [vmem:[#allocation0] sm:$0x3] %vm88_vm12, %v87_v27  }
  0x8c   :  { %v94_v28 = vpop.permute.xlu0 %93  }
  0x8d   :  { %96 = vst.msk [vmem:[#allocation0] sm:$0x3] %vm95_vm13, %v94_v28   ;;  %v101_v29 = vpop.permute.xlu1 %100  }
  0x8e   :  { %103 = vst.msk [vmem:[#allocation0] sm:$0x3] %vm102_vm14, %v101_v29  }
  0x90   :  { %v108_v30 = vpop.permute.xlu0 %107  }
  0x91   :  { %110 = vst.msk [vmem:[#allocation0] sm:$0x3] %vm109_vm15, %v108_v30  }
  0x98   :  { %v114_v31 = vld [vmem:[#allocation0] sm:$0x3] }
  0x99   :  { %116 = vst [vmem:[%s224_s1] sm:$0x3] %v114_v31 }

// kernel: tile.11
= control target key start
LH: loop header
LB: loop body
LE: loop exit
PB: predicated region body
PF: predicated region fallthrough
CT: control target
= control target key end

     0   :  { %vm6_vm0 = vcmask 1043458   ;;  %vm10_vm1 = vcmask 1045508   ;;  %vm14_vm2 = vcmask 1047558   ;;  %s58_s6 = smov 3  ;;  %s61_s7 = smov 12  ;;  %vm16_vm3 = vcmask 15360   ;;  %s1853_s0 = inlined_call_operand.vmem [shape: f32[2,3,3,16,1,1,2], index: 0, kind: input, shape index: {}]   ;;  %s1854_s1 = inlined_call_operand.vmem [shape: f32[2,3,3,32], index: 1, kind: output, shape index: {}]  }
   0x1   :  { %v1097_v0 = vld [vmem:[%s1853_s0 + $0xf] ss:$16 sm:%s58_s6]   ;;  %s66_s12 = smov 48  ;;  %s71_s13 = smov 192  ;;  %vm77_vm4 = vcmask 261360   ;;  %vm142_vm5 = vcmask 244960  }
   0x2   :  { %v1098_v1 = vld [vmem:[%s1853_s0 + $0xf] ss:$16 sm:%s61_s7]   ;;  %s115_s18 = smov 3  ;;  %s86_s21 = smov 3  ;;  %vm207_vm6 = vcmask 228560   ;;  %vm272_vm7 = vcmask 212160  }
   0x3   :  { %v64_v2 = vsel %vm6_vm0, %v1098_v1, %v1097_v0  ;;  %v1099_v3 = vld [vmem:[%s1853_s0 + $0xf] ss:$16 sm:%s66_s12]   ;;  %s89_s22 = smov 12  ;;  %s1255_s23 = smov 30   ;;  %vm337_vm8 = vcmask 195760   ;;  %vm402_vm9 = vcmask 179360  }
   0x4   :  { %v1100_v4 = vld [vmem:[%s1853_s0 + $0xf] ss:$16 sm:%s71_s13]   ;;  %v69_v5 = vsel %vm10_vm1, %v1099_v3, %v64_v2  ;;  %s94_s26 = smov 48  ;;  %s99_s27 = smov 192  ;;  %vm467_vm10 = vcmask 162960   ;;  %vm532_vm11 = vcmask 146560  }
   0x5   :  { %v1105_v6 = vld [vmem:[%s1853_s0 + $0x10f] ss:$16 sm:%s115_s18]   ;;  %v74_v7 = vsel %vm14_vm2, %v1100_v4, %v69_v5  ;;  %s123_s30 = smov 3  ;;  %s126_s2 = smov 12  ;;  %vm597_vm12 = vcmask 130160   ;;  %vm662_vm13 = vcmask 113760  }
   0x6   :  { %117 = vrot.lane.b32.xlu1 %v1105_v6, %s1255_s23  ;;  %v1101_v8 = vld [vmem:[%s1853_s0 + $0x8f] ss:$16 sm:%s86_s21]   ;;  %75 = vrot.lane.b32.xlu0 %v74_v7, %s1255_s23  ;;  %s131_s7 = smov 48  ;;  %s136_s8 = smov 192  ;;  %vm727_vm14 = vcmask 97360   ;;  %vm792_vm15 = vcmask 80960  }
   0x7   :  { %v1102_v9 = vld [vmem:[%s1853_s0 + $0x8f] ss:$16 sm:%s89_s22]   ;;  %v1106_v14 = vld [vmem:[%s1853_s0 + $0xe] ss:$16 sm:%s123_s30]   ;;  %s151_s13 = smov 3  ;;  %s154_s18 = smov 12 }
   0x8   :  { %v92_v10 = vsel %vm6_vm0, %v1102_v9, %v1101_v8  ;;  %v1103_v11 = vld [vmem:[%s1853_s0 + $0x8f] ss:$16 sm:%s94_s26]   ;;  %v1107_v15 = vld [vmem:[%s1853_s0 + $0xe] ss:$16 sm:%s126_s2]   ;;  %s159_s19 = smov 48  ;;  %s164_s22 = smov 192 }
   0x9   :  { %v1104_v12 = vld [vmem:[%s1853_s0 + $0x8f] ss:$16 sm:%s99_s27]   ;;  %v97_v13 = vsel %vm10_vm1, %v1103_v11, %v92_v10  ;;  %v129_v17 = vsel %vm6_vm0, %v1107_v15, %v1106_v14  ;;  %v1108_v18 = vld [vmem:[%s1853_s0 + $0xe] ss:$16 sm:%s131_s7]   ;;  %s188_s28 = smov 3  ;;  %s191_s29 = smov 12 }
   0xa   :  { %v102_v16 = vsel %vm14_vm2, %v1104_v12, %v97_v13  ;;  %v1109_v19 = vld [vmem:[%s1853_s0 + $0xe] ss:$16 sm:%s136_s8]   ;;  %v134_v20 = vsel %vm10_vm1, %v1108_v18, %v129_v17  ;;  %s1256_s30 = smov 28   ;;  %s196_s4 = smov 48  ;;  %v1115_v29 = vld [vmem:[%s1853_s0 + $0xd] ss:$16 sm:%s188_s28]  }
   0xb   :  { %103 = vrot.lane.b32.xlu0 %v102_v16, %s1255_s23  ;;  %v1110_v21 = vld [vmem:[%s1853_s0 + $0x8e] ss:$16 sm:%s151_s13]   ;;  %s180_s23 = smov 3  ;;  %v139_v22 = vsel %vm14_vm2, %v1109_v19, %v134_v20  ;;  %s201_s5 = smov 192 }
   0xc   :  { %v1111_v23 = vld [vmem:[%s1853_s0 + $0x8e] ss:$16 sm:%s154_s18]   ;;  %140 = vrot.lane.b32.xlu1 %v139_v22, %s1256_s30  ;;  %s216_s10 = smov 3  ;;  %s219_s15 = smov 12 }
   0xd   :  { %v1112_v24 = vld [vmem:[%s1853_s0 + $0x8e] ss:$16 sm:%s159_s19]   ;;  %v157_v25 = vsel %vm6_vm0, %v1111_v23, %v1110_v21  ;;  %v1116_v31 = vld [vmem:[%s1853_s0 + $0xd] ss:$16 sm:%s191_s29]   ;;  %s224_s16 = smov 48  ;;  %s229_s19 = smov 192 }
   0xe   :  { %v1113_v26 = vld [vmem:[%s1853_s0 + $0x8e] ss:$16 sm:%s164_s22]   ;;  %v162_v27 = vsel %vm10_vm1, %v1112_v24, %v157_v25  ;;  %v1117_v32 = vld [vmem:[%s1853_s0 + $0xd] ss:$16 sm:%s196_s4]   ;;  %v194_v33 = vsel %vm6_vm0, %v1116_v31, %v1115_v29  ;;  %s245_s20 = smov 3  ;;  %s256_s28 = smov 12 }
   0xf   :  { %v1114_v28 = vld [vmem:[%s1853_s0 + $0x10e] ss:$16 sm:%s180_s23]   ;;  %v167_v30 = vsel %vm14_vm2, %v1113_v26, %v162_v27  ;;  %v1118_v34 = vld [vmem:[%s1853_s0 + $0xd] ss:$16 sm:%s201_s5]   ;;  %v199_v35 = vsel %vm10_vm1, %v1117_v32, %v194_v33  ;;  %s253_s23 = smov 3  ;;  %s261_s29 = smov 48 }
  0x10   :  { %168 = vrot.lane.b32.xlu0 %v167_v30, %s1256_s30  ;;  %182 = vrot.lane.b32.xlu1 %v1114_v28, %s1256_s30  ;;  %v1119_v36 = vld [vmem:[%s1853_s0 + $0x8d] ss:$16 sm:%s216_s10]   ;;  %v204_v37 = vsel %vm14_vm2, %v1118_v34, %v199_v35  ;;  %s266_s5 = smov 192  ;;  %s1257_s6 = smov 26  }
  0x11   :  { %v1120_v38 = vld [vmem:[%s1853_s0 + $0x8d] ss:$16 sm:%s219_s15]   ;;  %v1124_v44 = vld [vmem:[%s1853_s0 + $0xc] ss:$16 sm:%s253_s23]   ;;  %s281_s9 = smov 3  ;;  %s284_s10 = smov 12 }
  0x12   :  { %v1121_v39 = vld [vmem:[%s1853_s0 + $0x8d] ss:$16 sm:%s224_s16]   ;;  %v222_v40 = vsel %vm6_vm0, %v1120_v38, %v1119_v36  ;;  %v1125_v46 = vld [vmem:[%s1853_s0 + $0xc] ss:$16 sm:%s256_s28]   ;;  %s289_s15 = smov 48  ;;  %s294_s18 = smov 192 }
  0x13   :  { %v1122_v41 = vld [vmem:[%s1853_s0 + $0x8d] ss:$16 sm:%s229_s19]   ;;  %v227_v43 = vsel %vm10_vm1, %v1121_v39, %v222_v40  ;;  %v1126_v47 = vld [vmem:[%s1853_s0 + $0xc] ss:$16 sm:%s261_s29]   ;;  %v259_v48 = vsel %vm6_vm0, %v1125_v46, %v1124_v44  ;;  %s310_s19 = smov 3  ;;  %s318_s24 = smov 3 }
  0x14   :  { %v1123_v42 = vld [vmem:[%s1853_s0 + $0x10d] ss:$16 sm:%s245_s20]   ;;  %205 = vrot.lane.b32.xlu0 %v204_v37, %s1257_s6  ;;  %v232_v45 = vsel %vm14_vm2, %v1122_v41, %v227_v43  ;;  %v264_v50 = vsel %vm10_vm1, %v1126_v47, %v259_v48  ;;  %s321_s27 = smov 12  ;;  %s326_s28 = smov 48 }
  0x15   :  { %233 = vrot.lane.b32.xlu1 %v232_v45, %s1257_s6  ;;  %v1127_v49 = vld [vmem:[%s1853_s0 + $0xc] ss:$16 sm:%s266_s5]   ;;  %s331_s4 = smov 192  ;;  %s1258_s5 = smov 24  }
  0x16   :  { %v1128_v51 = vld [vmem:[%s1853_s0 + $0x8c] ss:$16 sm:%s281_s9]   ;;  %v269_v53 = vsel %vm14_vm2, %v1127_v49, %v264_v50  ;;  %v1133_v60 = vld [vmem:[%s1853_s0 + $0xb] ss:$16 sm:%s318_s24]   ;;  %s346_s8 = smov 3  ;;  %s349_s9 = smov 12 }
  0x17   :  { %v1129_v52 = vld [vmem:[%s1853_s0 + $0x8c] ss:$16 sm:%s284_s10]   ;;  %v1134_v61 = vld [vmem:[%s1853_s0 + $0xb] ss:$16 sm:%s321_s27]   ;;  %s354_s14 = smov 48  ;;  %s359_s17 = smov 192 }
  0x18   :  { %247 = vrot.lane.b32.xlu0 %v1123_v42, %s1257_s6  ;;  %v287_v54 = vsel %vm6_vm0, %v1129_v52, %v1128_v51  ;;  %v1130_v55 = vld [vmem:[%s1853_s0 + $0x8c] ss:$16 sm:%s289_s15]   ;;  %v324_v63 = vsel %vm6_vm0, %v1134_v61, %v1133_v60  ;;  %s383_s23 = smov 3  ;;  %s386_s26 = smov 12 }
  0x19   :  { %v292_v56 = vsel %vm10_vm1, %v1130_v55, %v287_v54  ;;  %v1131_v57 = vld [vmem:[%s1853_s0 + $0x8c] ss:$16 sm:%s294_s18]   ;;  %270 = vrot.lane.b32.xlu1 %v269_v53, %s1258_s5  ;;  %s375_s18 = smov 3  ;;  %s391_s27 = smov 48 }
  0x1a   :  { %v1132_v58 = vld [vmem:[%s1853_s0 + $0x10c] ss:$16 sm:%s310_s19]   ;;  %v297_v59 = vsel %vm14_vm2, %v1131_v57, %v292_v56  ;;  %v1135_v62 = vld [vmem:[%s1853_s0 + $0xb] ss:$16 sm:%s326_s28]   ;;  %s396_s3 = smov 192  ;;  %s411_s7 = smov 3 }
  0x1b   :  { %v1136_v0 = vld [vmem:[%s1853_s0 + $0xb] ss:$16 sm:%s331_s4]   ;;  %v329_v1 = vsel %vm10_vm1, %v1135_v62, %v324_v63  ;;  %s1259_s4 = smov 22   ;;  %v1142_v11 = vld [vmem:[%s1853_s0 + $0xa] ss:$16 sm:%s383_s23]   ;;  %s419_s13 = smov 48 }
  0x1c   :  { %298 = vrot.lane.b32.xlu0 %v297_v59, %s1258_s5  ;;  %v1137_v2 = vld [vmem:[%s1853_s0 + $0x8b] ss:$16 sm:%s346_s8]   ;;  %v334_v4 = vsel %vm14_vm2, %v1136_v0, %v329_v1  ;;  %s414_s8 = smov 12  ;;  %s424_s16 = smov 192 }
  0x1d   :  { %v1138_v3 = vld [vmem:[%s1853_s0 + $0x8b] ss:$16 sm:%s349_s9]   ;;  %312 = vrot.lane.b32.xlu1 %v1132_v58, %s1258_s5  ;;  %s448_s22 = smov 3  ;;  %s451_s25 = smov 12 }
  0x1e   :  { %v352_v5 = vsel %vm6_vm0, %v1138_v3, %v1137_v2  ;;  %v1139_v6 = vld [vmem:[%s1853_s0 + $0x8b] ss:$16 sm:%s354_s14]   ;;  %v1143_v12 = vld [vmem:[%s1853_s0 + $0xa] ss:$16 sm:%s386_s26]   ;;  %s456_s26 = smov 48  ;;  %s461_s2 = smov 192 }
  0x1f   :  { %v357_v7 = vsel %vm10_vm1, %v1139_v6, %v352_v5  ;;  %v1140_v8 = vld [vmem:[%s1853_s0 + $0x8b] ss:$16 sm:%s359_s17]   ;;  %v1144_v13 = vld [vmem:[%s1853_s0 + $0xa] ss:$16 sm:%s391_s27]   ;;  %v389_v14 = vsel %vm6_vm0, %v1143_v12, %v1142_v11  ;;  %s440_s17 = smov 3  ;;  %s476_s6 = smov 3 }
  0x20   :  { %v1141_v9 = vld [vmem:[%s1853_s0 + $0x10b] ss:$16 sm:%s375_s18]   ;;  %335 = vrot.lane.b32.xlu0 %v334_v4, %s1259_s4  ;;  %v362_v10 = vsel %vm14_vm2, %v1140_v8, %v357_v7  ;;  %v394_v16 = vsel %vm10_vm1, %v1144_v13, %v389_v14  ;;  %s484_s12 = smov 48  ;;  %s489_s15 = smov 192 }
  0x21   :  { %363 = vrot.lane.b32.xlu1 %v362_v10, %s1259_s4  ;;  %v1145_v15 = vld [vmem:[%s1853_s0 + $0xa] ss:$16 sm:%s396_s3]   ;;  %s1260_s3 = smov 20   ;;  %s513_s21 = smov 3 }
  0x22   :  { %v1146_v17 = vld [vmem:[%s1853_s0 + $0x8a] ss:$16 sm:%s411_s7]   ;;  %v399_v19 = vsel %vm14_vm2, %v1145_v15, %v394_v16  ;;  %v1151_v26 = vld [vmem:[%s1853_s0 + $0x9] ss:$16 sm:%s448_s22]   ;;  %s479_s7 = smov 12  ;;  %s516_s24 = smov 12 }
  0x23   :  { %v1147_v18 = vld [vmem:[%s1853_s0 + $0x8a] ss:$16 sm:%s414_s8]   ;;  %v1152_v27 = vld [vmem:[%s1853_s0 + $0x9] ss:$16 sm:%s451_s25]   ;;  %s521_s25 = smov 48  ;;  %s526_s30 = smov 192 }
  0x24   :  { %377 = vrot.lane.b32.xlu0 %v1141_v9, %s1259_s4  ;;  %v417_v20 = vsel %vm6_vm0, %v1147_v18, %v1146_v17  ;;  %v1148_v21 = vld [vmem:[%s1853_s0 + $0x8a] ss:$16 sm:%s419_s13]   ;;  %v454_v29 = vsel %vm6_vm0, %v1152_v27, %v1151_v26  ;;  %s541_s5 = smov 3  ;;  %s549_s11 = smov 48 }
  0x25   :  { %v422_v22 = vsel %vm10_vm1, %v1148_v21, %v417_v20  ;;  %v1149_v23 = vld [vmem:[%s1853_s0 + $0x8a] ss:$16 sm:%s424_s16]   ;;  %400 = vrot.lane.b32.xlu1 %v399_v19, %s1260_s3  ;;  %s505_s16 = smov 3  ;;  %s554_s14 = smov 192 }
  0x26   :  { %v1150_v24 = vld [vmem:[%s1853_s0 + $0x10a] ss:$16 sm:%s440_s17]   ;;  %v427_v25 = vsel %vm14_vm2, %v1149_v23, %v422_v22  ;;  %v1153_v28 = vld [vmem:[%s1853_s0 + $0x9] ss:$16 sm:%s456_s26]   ;;  %s578_s20 = smov 3  ;;  %s581_s23 = smov 12 }
  0x27   :  { %v1154_v30 = vld [vmem:[%s1853_s0 + $0x9] ss:$16 sm:%s461_s2]   ;;  %v459_v31 = vsel %vm10_vm1, %v1153_v28, %v454_v29  ;;  %s1261_s2 = smov 18   ;;  %v1160_v41 = vld [vmem:[%s1853_s0 + $0x8] ss:$16 sm:%s513_s21]   ;;  %s591_s29 = smov 192 }
  0x28   :  { %428 = vrot.lane.b32.xlu0 %v427_v25, %s1260_s3  ;;  %v1155_v32 = vld [vmem:[%s1853_s0 + $0x89] ss:$16 sm:%s476_s6]   ;;  %v464_v34 = vsel %vm14_vm2, %v1154_v30, %v459_v31  ;;  %s544_s6 = smov 12  ;;  %s606_s4 = smov 3 }
  0x29   :  { %v1156_v33 = vld [vmem:[%s1853_s0 + $0x89] ss:$16 sm:%s479_s7]   ;;  %442 = vrot.lane.b32.xlu1 %v1150_v24, %s1260_s3  ;;  %s614_s10 = smov 48  ;;  %s619_s13 = smov 192 }
  0x2a   :  { %v482_v35 = vsel %vm6_vm0, %v1156_v33, %v1155_v32  ;;  %v1157_v36 = vld [vmem:[%s1853_s0 + $0x89] ss:$16 sm:%s484_s12]   ;;  %v1161_v42 = vld [vmem:[%s1853_s0 + $0x8] ss:$16 sm:%s516_s24]   ;;  %s586_s24 = smov 48  ;;  %s643_s19 = smov 3 }
  0x2b   :  { %v487_v37 = vsel %vm10_vm1, %v1157_v36, %v482_v35  ;;  %v1158_v38 = vld [vmem:[%s1853_s0 + $0x89] ss:$16 sm:%s489_s15]   ;;  %v1162_v43 = vld [vmem:[%s1853_s0 + $0x8] ss:$16 sm:%s521_s25]   ;;  %v519_v44 = vsel %vm6_vm0, %v1161_v42, %v1160_v41  ;;  %s570_s15 = smov 3  ;;  %s646_s22 = smov 12 }
  0x2c   :  { %v1159_v39 = vld [vmem:[%s1853_s0 + $0x109] ss:$16 sm:%s505_s16]   ;;  %465 = vrot.lane.b32.xlu0 %v464_v34, %s1261_s2  ;;  %v492_v40 = vsel %vm14_vm2, %v1158_v38, %v487_v37  ;;  %v524_v46 = vsel %vm10_vm1, %v1162_v43, %v519_v44  ;;  %s656_s28 = smov 192  ;;  %s671_s3 = smov 3 }
  0x2d   :  { %493 = vrot.lane.b32.xlu1 %v492_v40, %s1261_s2  ;;  %v1163_v45 = vld [vmem:[%s1853_s0 + $0x8] ss:$16 sm:%s526_s30]   ;;  %s1262_s30 = smov 16   ;;  %s679_s9 = smov 48 }
  0x2e   :  { %v1164_v47 = vld [vmem:[%s1853_s0 + $0x88] ss:$16 sm:%s541_s5]   ;;  %v529_v49 = vsel %vm14_vm2, %v1163_v45, %v524_v46  ;;  %v1169_v56 = vld [vmem:[%s1853_s0 + $0x7] ss:$16 sm:%s578_s20]   ;;  %s609_s5 = smov 12  ;;  %s684_s12 = smov 192 }
  0x2f   :  { %v1165_v48 = vld [vmem:[%s1853_s0 + $0x88] ss:$16 sm:%s544_s6]   ;;  %v1170_v57 = vld [vmem:[%s1853_s0 + $0x7] ss:$16 sm:%s581_s23]   ;;  %s651_s23 = smov 48  ;;  %s708_s18 = smov 3 }
  0x30   :  { %507 = vrot.lane.b32.xlu0 %v1159_v39, %s1261_s2  ;;  %v547_v50 = vsel %vm6_vm0, %v1165_v48, %v1164_v47  ;;  %v1166_v51 = vld [vmem:[%s1853_s0 + $0x88] ss:$16 sm:%s549_s11]   ;;  %v584_v59 = vsel %vm6_vm0, %v1170_v57, %v1169_v56  ;;  %s711_s21 = smov 12  ;;  %s721_s27 = smov 192 }
  0x31   :  { %v552_v52 = vsel %vm10_vm1, %v1166_v51, %v547_v50  ;;  %v1167_v53 = vld [vmem:[%s1853_s0 + $0x88] ss:$16 sm:%s554_s14]   ;;  %530 = vrot.lane.b32.xlu1 %v529_v49, %s1262_s30  ;;  %s635_s14 = smov 3  ;;  %s736_s2 = smov 3 }
  0x32   :  { %v1168_v54 = vld [vmem:[%s1853_s0 + $0x108] ss:$16 sm:%s570_s15]   ;;  %v557_v55 = vsel %vm14_vm2, %v1167_v53, %v552_v52  ;;  %v1171_v58 = vld [vmem:[%s1853_s0 + $0x7] ss:$16 sm:%s586_s24]   ;;  %s744_s8 = smov 48  ;;  %s749_s11 = smov 192 }
  0x33   :  { %v1172_v60 = vld [vmem:[%s1853_s0 + $0x7] ss:$16 sm:%s591_s29]   ;;  %v589_v61 = vsel %vm10_vm1, %v1171_v58, %v584_v59  ;;  %s1263_s29 = smov 14   ;;  %v1178_v7 = vld [vmem:[%s1853_s0 + $0x6] ss:$16 sm:%s643_s19]   ;;  %s773_s17 = smov 3 }
  0x34   :  { %558 = vrot.lane.b32.xlu0 %v557_v55, %s1262_s30  ;;  %v1173_v62 = vld [vmem:[%s1853_s0 + $0x87] ss:$16 sm:%s606_s4]   ;;  %v594_v0 = vsel %vm14_vm2, %v1172_v60, %v589_v61  ;;  %s674_s4 = smov 12  ;;  %s776_s20 = smov 12 }
  0x35   :  { %v1174_v63 = vld [vmem:[%s1853_s0 + $0x87] ss:$16 sm:%s609_s5]   ;;  %572 = vrot.lane.b32.xlu1 %v1168_v54, %s1262_s30  ;;  %s786_s26 = smov 192  ;;  %s801_s30 = smov 3 }
  0x36   :  { %v612_v1 = vsel %vm6_vm0, %v1174_v63, %v1173_v62  ;;  %v1175_v2 = vld [vmem:[%s1853_s0 + $0x87] ss:$16 sm:%s614_s10]   ;;  %v1179_v8 = vld [vmem:[%s1853_s0 + $0x6] ss:$16 sm:%s646_s22]   ;;  %s716_s22 = smov 48  ;;  %s809_s7 = smov 48 }
  0x37   :  { %v617_v3 = vsel %vm10_vm1, %v1175_v2, %v612_v1  ;;  %v1176_v4 = vld [vmem:[%s1853_s0 + $0x87] ss:$16 sm:%s619_s13]   ;;  %v1180_v9 = vld [vmem:[%s1853_s0 + $0x6] ss:$16 sm:%s651_s23]   ;;  %v649_v10 = vsel %vm6_vm0, %v1179_v8, %v1178_v7  ;;  %s700_s13 = smov 3  ;;  %s814_s10 = smov 192 }
  0x38   :  { %v1177_v5 = vld [vmem:[%s1853_s0 + $0x107] ss:$16 sm:%s635_s14]   ;;  %595 = vrot.lane.b32.xlu0 %v594_v0, %s1263_s29  ;;  %v622_v6 = vsel %vm14_vm2, %v1176_v4, %v617_v3  ;;  %v654_v12 = vsel %vm10_vm1, %v1180_v9, %v649_v10  ;;  %s838_s16 = smov 3  ;;  %s841_s19 = smov 12 }
  0x39   :  { %623 = vrot.lane.b32.xlu1 %v622_v6, %s1263_s29  ;;  %v1181_v11 = vld [vmem:[%s1853_s0 + $0x6] ss:$16 sm:%s656_s28]   ;;  %s1264_s28 = smov 12   ;;  %s851_s25 = smov 192 }
  0x3a   :  { %v1182_v13 = vld [vmem:[%s1853_s0 + $0x86] ss:$16 sm:%s671_s3]   ;;  %v659_v15 = vsel %vm14_vm2, %v1181_v11, %v654_v12  ;;  %v1187_v22 = vld [vmem:[%s1853_s0 + $0x5] ss:$16 sm:%s708_s18]   ;;  %s739_s3 = smov 12  ;;  %s874_s6 = smov 48 }
  0x3b   :  { %v1183_v14 = vld [vmem:[%s1853_s0 + $0x86] ss:$16 sm:%s674_s4]   ;;  %v1188_v23 = vld [vmem:[%s1853_s0 + $0x5] ss:$16 sm:%s711_s21]   ;;  %s781_s21 = smov 48  ;;  %s903_s15 = smov 3 }
  0x3c   :  { %637 = vrot.lane.b32.xlu0 %v1177_v5, %s1263_s29  ;;  %v677_v16 = vsel %vm6_vm0, %v1183_v14, %v1182_v13  ;;  %v1184_v17 = vld [vmem:[%s1853_s0 + $0x86] ss:$16 sm:%s679_s9]   ;;  %v714_v25 = vsel %vm6_vm0, %v1188_v23, %v1187_v22  ;;  %s866_s29 = smov 3  ;;  %s879_s9 = smov 192 }
  0x3d   :  { %v682_v18 = vsel %vm10_vm1, %v1184_v17, %v677_v16  ;;  %v1185_v19 = vld [vmem:[%s1853_s0 + $0x86] ss:$16 sm:%s684_s12]   ;;  %660 = vrot.lane.b32.xlu1 %v659_v15, %s1264_s28  ;;  %s765_s12 = smov 3  ;;  %s906_s18 = smov 12 }
  0x3e   :  { %v1186_v20 = vld [vmem:[%s1853_s0 + $0x106] ss:$16 sm:%s700_s13]   ;;  %v687_v21 = vsel %vm14_vm2, %v1185_v19, %v682_v18  ;;  %v1189_v24 = vld [vmem:[%s1853_s0 + $0x5] ss:$16 sm:%s716_s22]   ;;  %s916_s24 = smov 192  ;;  %s939_s5 = smov 48 }
  0x3f   :  { %v1190_v26 = vld [vmem:[%s1853_s0 + $0x5] ss:$16 sm:%s721_s27]   ;;  %v719_v27 = vsel %vm10_vm1, %v1189_v24, %v714_v25  ;;  %s1265_s27 = smov 10   ;;  %v1196_v37 = vld [vmem:[%s1853_s0 + $0x4] ss:$16 sm:%s773_s17]   ;;  %s968_s14 = smov 3 }
  0x40   :  { %688 = vrot.lane.b32.xlu0 %v687_v21, %s1264_s28  ;;  %v1191_v28 = vld [vmem:[%s1853_s0 + $0x85] ss:$16 sm:%s736_s2]   ;;  %v724_v30 = vsel %vm14_vm2, %v1190_v26, %v719_v27  ;;  %s804_s2 = smov 12  ;;  %s971_s17 = smov 12 }
  0x41   :  { %v1192_v29 = vld [vmem:[%s1853_s0 + $0x85] ss:$16 sm:%s739_s3]   ;;  %702 = vrot.lane.b32.xlu1 %v1186_v20, %s1264_s28  ;;  %s931_s28 = smov 3  ;;  %s981_s23 = smov 192 }
  0x42   :  { %v742_v31 = vsel %vm6_vm0, %v1192_v29, %v1191_v28  ;;  %v1193_v32 = vld [vmem:[%s1853_s0 + $0x85] ss:$16 sm:%s744_s8]   ;;  %v1197_v38 = vld [vmem:[%s1853_s0 + $0x4] ss:$16 sm:%s776_s20]   ;;  %s846_s20 = smov 48  ;;  %s944_s8 = smov 192 }
  0x43   :  { %v747_v33 = vsel %vm10_vm1, %v1193_v32, %v742_v31  ;;  %v1194_v34 = vld [vmem:[%s1853_s0 + $0x85] ss:$16 sm:%s749_s11]   ;;  %v1198_v39 = vld [vmem:[%s1853_s0 + $0x4] ss:$16 sm:%s781_s21]   ;;  %v779_v40 = vsel %vm6_vm0, %v1197_v38, %v1196_v37  ;;  %s830_s11 = smov 3  ;;  %s1004_s4 = smov 48 }
  0x44   :  { %v1195_v35 = vld [vmem:[%s1853_s0 + $0x105] ss:$16 sm:%s765_s12]   ;;  %725 = vrot.lane.b32.xlu0 %v724_v30, %s1265_s27  ;;  %v752_v36 = vsel %vm14_vm2, %v1194_v34, %v747_v33  ;;  %v784_v42 = vsel %vm10_vm1, %v1198_v39, %v779_v40  ;;  %s8_s13 = smov 48  ;;  %s4_s22 = smov 12 }
  0x45   :  { %753 = vrot.lane.b32.xlu1 %v752_v36, %s1265_s27  ;;  %v1199_v41 = vld [vmem:[%s1853_s0 + $0x4] ss:$16 sm:%s786_s26]   ;;  %s1266_s26 = smov 8   ;;  %s28_s3 = smov 12 }
  0x46   :  { %v1200_v43 = vld [vmem:[%s1853_s0 + $0x84] ss:$16 sm:%s801_s30]   ;;  %v789_v45 = vsel %vm14_vm2, %v1199_v41, %v784_v42  ;;  %v1205_v52 = vld [vmem:[%s1853_s0 + $0x3] ss:$16 sm:%s838_s16]   ;;  %s869_s30 = smov 12  ;;  %s12_s16 = smov 192 }
  0x47   :  { %v1201_v44 = vld [vmem:[%s1853_s0 + $0x84] ss:$16 sm:%s804_s2]   ;;  %v1206_v53 = vld [vmem:[%s1853_s0 + $0x3] ss:$16 sm:%s841_s19]   ;;  %s911_s19 = smov 48 }
  0x48   :  { %767 = vrot.lane.b32.xlu0 %v1195_v35, %s1265_s27  ;;  %v807_v46 = vsel %vm6_vm0, %v1201_v44, %v1200_v43  ;;  %v1202_v47 = vld [vmem:[%s1853_s0 + $0x84] ss:$16 sm:%s809_s7]   ;;  %v844_v55 = vsel %vm6_vm0, %v1206_v53, %v1205_v52  ;;  %s996_s27 = smov 3  ;;  %s1009_s7 = smov 192 }
  0x49   :  { %v812_v48 = vsel %vm10_vm1, %v1202_v47, %v807_v46  ;;  %v1203_v49 = vld [vmem:[%s1853_s0 + $0x84] ss:$16 sm:%s814_s10]   ;;  %790 = vrot.lane.b32.xlu1 %v789_v45, %s1266_s26  ;;  %s895_s10 = smov 3 }
  0x4a   :  { %v1204_v50 = vld [vmem:[%s1853_s0 + $0x104] ss:$16 sm:%s830_s11]   ;;  %v817_v51 = vsel %vm14_vm2, %v1203_v49, %v812_v48  ;;  %v1207_v54 = vld [vmem:[%s1853_s0 + $0x3] ss:$16 sm:%s846_s20]  }
  0x4b   :  { %v1208_v56 = vld [vmem:[%s1853_s0 + $0x3] ss:$16 sm:%s851_s25]   ;;  %v849_v57 = vsel %vm10_vm1, %v1207_v54, %v844_v55  ;;  %s1267_s25 = smov 6   ;;  %v1214_v3 = vld [vmem:[%s1853_s0 + $0x2] ss:$16 sm:%s903_s15]  }
  0x4c   :  { %818 = vrot.lane.b32.xlu0 %v817_v51, %s1266_s26  ;;  %v1209_v58 = vld [vmem:[%s1853_s0 + $0x83] ss:$16 sm:%s866_s29]   ;;  %v854_v60 = vsel %vm14_vm2, %v1208_v56, %v849_v57  ;;  %s934_s29 = smov 12 }
  0x4d   :  { %v1210_v59 = vld [vmem:[%s1853_s0 + $0x83] ss:$16 sm:%s869_s30]   ;;  %832 = vrot.lane.b32.xlu1 %v1204_v50, %s1266_s26  ;;  %s52_s26 = smov 3 }
  0x4e   :  { %v872_v61 = vsel %vm6_vm0, %v1210_v59, %v1209_v58  ;;  %v1211_v62 = vld [vmem:[%s1853_s0 + $0x83] ss:$16 sm:%s874_s6]   ;;  %v1215_v4 = vld [vmem:[%s1853_s0 + $0x2] ss:$16 sm:%s906_s18]   ;;  %s976_s18 = smov 48  ;;  %s33_s6 = smov 48 }
  0x4f   :  { %v877_v63 = vsel %vm10_vm1, %v1211_v62, %v872_v61  ;;  %v1212_v0 = vld [vmem:[%s1853_s0 + $0x83] ss:$16 sm:%s879_s9]   ;;  %v1216_v5 = vld [vmem:[%s1853_s0 + $0x2] ss:$16 sm:%s911_s19]   ;;  %v909_v6 = vsel %vm6_vm0, %v1215_v4, %v1214_v3  ;;  %s960_s9 = smov 3 }
  0x50   :  { %v1213_v1 = vld [vmem:[%s1853_s0 + $0x103] ss:$16 sm:%s895_s10]   ;;  %855 = vrot.lane.b32.xlu0 %v854_v60, %s1267_s25  ;;  %v882_v2 = vsel %vm14_vm2, %v1212_v0, %v877_v63  ;;  %v914_v8 = vsel %vm10_vm1, %v1216_v5, %v909_v6 }
  0x51   :  { %883 = vrot.lane.b32.xlu1 %v882_v2, %s1267_s25  ;;  %v1217_v7 = vld [vmem:[%s1853_s0 + $0x2] ss:$16 sm:%s916_s24]   ;;  %s1268_s24 = smov 4  }
  0x52   :  { %v1218_v9 = vld [vmem:[%s1853_s0 + $0x82] ss:$16 sm:%s931_s28]   ;;  %v919_v11 = vsel %vm14_vm2, %v1217_v7, %v914_v8  ;;  %v1223_v18 = vld [vmem:[%s1853_s0 + $0x1] ss:$16 sm:%s968_s14]   ;;  %s999_s28 = smov 12 }
  0x53   :  { %v1219_v10 = vld [vmem:[%s1853_s0 + $0x82] ss:$16 sm:%s934_s29]   ;;  %v1224_v19 = vld [vmem:[%s1853_s0 + $0x1] ss:$16 sm:%s971_s17]   ;;  %s2_s17 = smov 3 }
  0x54   :  { %897 = vrot.lane.b32.xlu0 %v1213_v1, %s1267_s25  ;;  %v937_v12 = vsel %vm6_vm0, %v1219_v10, %v1218_v9  ;;  %v1220_v13 = vld [vmem:[%s1853_s0 + $0x82] ss:$16 sm:%s939_s5]   ;;  %v974_v21 = vsel %vm6_vm0, %v1224_v19, %v1223_v18 }
  0x55   :  { %v942_v14 = vsel %vm10_vm1, %v1220_v13, %v937_v12  ;;  %v1221_v15 = vld [vmem:[%s1853_s0 + $0x82] ss:$16 sm:%s944_s8]   ;;  %920 = vrot.lane.b32.xlu1 %v919_v11, %s1268_s24  ;;  %s1025_s8 = smov 3 }
  0x56   :  { %v1222_v16 = vld [vmem:[%s1853_s0 + $0x102] ss:$16 sm:%s960_s9]   ;;  %v947_v17 = vsel %vm14_vm2, %v1221_v15, %v942_v14  ;;  %v1225_v20 = vld [vmem:[%s1853_s0 + $0x1] ss:$16 sm:%s976_s18]  }
  0x57   :  { %v1226_v22 = vld [vmem:[%s1853_s0 + $0x1] ss:$16 sm:%s981_s23]   ;;  %v979_v23 = vsel %vm10_vm1, %v1225_v20, %v974_v21  ;;  %s1269_s23 = smov 2   ;;  %v9_v33 = vld [vmem:[%s1853_s0] ss:$16 sm:%s8_s13]  }
  0x58   :  { %948 = vrot.lane.b32.xlu0 %v947_v17, %s1268_s24  ;;  %v1227_v24 = vld [vmem:[%s1853_s0 + $0x81] ss:$16 sm:%s996_s27]   ;;  %v984_v26 = vsel %vm14_vm2, %v1226_v22, %v979_v23  ;;  %s25_s27 = smov 3 }
  0x59   :  { %v1228_v25 = vld [vmem:[%s1853_s0 + $0x81] ss:$16 sm:%s999_s28]   ;;  %962 = vrot.lane.b32.xlu1 %v1222_v16, %s1268_s24 }
  0x5a   :  { %v1002_v27 = vsel %vm6_vm0, %v1228_v25, %v1227_v24  ;;  %v1229_v28 = vld [vmem:[%s1853_s0 + $0x81] ss:$16 sm:%s1004_s4]   ;;  %v13_v34 = vld [vmem:[%s1853_s0] ss:$16 sm:%s12_s16]  }
  0x5b   :  { %v1007_v29 = vsel %vm10_vm1, %v1229_v28, %v1002_v27  ;;  %v1230_v30 = vld [vmem:[%s1853_s0 + $0x81] ss:$16 sm:%s1009_s7]   ;;  %v3_v35 = vld [vmem:[%s1853_s0] ss:$16 sm:%s2_s17]   ;;  %s38_s7 = smov 192 }
  0x5c   :  { %v1231_v31 = vld [vmem:[%s1853_s0 + $0x101] ss:$16 sm:%s1025_s8]   ;;  %985 = vrot.lane.b32.xlu0 %v984_v26, %s1269_s23  ;;  %v1012_v32 = vsel %vm14_vm2, %v1230_v30, %v1007_v29 }
  0x5d   :  { %1013 = vrot.lane.b32.xlu1 %v1012_v32, %s1269_s23  ;;  %v5_v36 = vld [vmem:[%s1853_s0] ss:$16 sm:%s4_s22]  }
  0x5e   :  { %v7_v37 = vsel %vm6_vm0, %v5_v36, %v3_v35  ;;  %v1096_v38 = vld [vmem:[%s1853_s0 + $0x100] ss:$16 sm:%s52_s26]  }
  0x5f   :  { %v1092_v39 = vld [vmem:[%s1853_s0 + $0x80] ss:$16 sm:%s25_s27]   ;;  %v11_v40 = vsel %vm10_vm1, %v9_v33, %v7_v37  ;;  %56 = vst.msk [vmem:[#allocation0 + $0x40] sm:$0x3] %vm16_vm3, %v1096_v38  }
  0x60   :  { %1027 = vrot.lane.b32.xlu0 %v1231_v31, %s1269_s23  ;;  %v1093_v41 = vld [vmem:[%s1853_s0 + $0x80] ss:$16 sm:%s28_s3]   ;;  %v15_v42 = vsel %vm14_vm2, %v13_v34, %v11_v40 }
  0x61   :  { %v1094_v43 = vld [vmem:[%s1853_s0 + $0x80] ss:$16 sm:%s33_s6]   ;;  %v31_v45 = vsel %vm6_vm0, %v1093_v41, %v1092_v39  ;;  %17 = vst.msk [vmem:[#allocation0] sm:$0x3] %vm16_vm3, %v15_v42   ;;  %19 = vst.msk [vmem:[#allocation0 + $0x6] sm:$0xc] %vm16_vm3, %v15_v42  }
  0x62   :  { %v1095_v44 = vld [vmem:[%s1853_s0 + $0x80] ss:$16 sm:%s38_s7]   ;;  %21 = vst.msk [vmem:[#allocation0 + $0xc] sm:$0x30] %vm16_vm3, %v15_v42   ;;  %23 = vst.msk [vmem:[#allocation0 + $0x12] sm:$0xc0] %vm16_vm3, %v15_v42   ;;  %v36_v46 = vsel %vm10_vm1, %v1094_v43, %v31_v45 }
  0x63   :  { %v41_v47 = vsel %vm14_vm2, %v1095_v44, %v36_v46  ;;  %vm857_vm0 = vcmask 64560   ;;  %vm922_vm1 = vcmask 48160   ;;  %vm987_vm2 = vcmask 31760  }
  0x64   :  { %44 = vst.msk [vmem:[#allocation0 + $0x20] sm:$0x3] %vm16_vm3, %v41_v47   ;;  %46 = vst.msk [vmem:[#allocation0 + $0x26] sm:$0xc] %vm16_vm3, %v41_v47  }
  0x65   :  { %48 = vst.msk [vmem:[#allocation0 + $0x2c] sm:$0x30] %vm16_vm3, %v41_v47   ;;  %50 = vst.msk [vmem:[#allocation0 + $0x32] sm:$0xc0] %vm16_vm3, %v41_v47  }
  0x78   :  { %v118_v48 = vpop.permute.xlu1 %117   ;;  %v76_v49 = vpop.permute.xlu0 %75  }
  0x79   :  { %121 = vst.msk [vmem:[#allocation0 + $0x40] sm:$0x3] %vm77_vm4, %v118_v48   ;;  %78 = vst.msk [vmem:[#allocation0] sm:$0x3] %vm77_vm4, %v76_v49  }
  0x7a   :  { %80 = vst.msk [vmem:[#allocation0 + $0x6] sm:$0xc] %vm77_vm4, %v76_v49   ;;  %82 = vst.msk [vmem:[#allocation0 + $0xc] sm:$0x30] %vm77_vm4, %v76_v49  }
  0x7b   :  { %84 = vst.msk [vmem:[#allocation0 + $0x12] sm:$0xc0] %vm77_vm4, %v76_v49  }
  0x7d   :  { %v104_v50 = vpop.permute.xlu0 %103  }
  0x7e   :  { %107 = vst.msk [vmem:[#allocation0 + $0x20] sm:$0x3] %vm77_vm4, %v104_v50   ;;  %109 = vst.msk [vmem:[#allocation0 + $0x26] sm:$0xc] %vm77_vm4, %v104_v50   ;;  %v141_v51 = vpop.permute.xlu1 %140  }
  0x7f   :  { %111 = vst.msk [vmem:[#allocation0 + $0x2c] sm:$0x30] %vm77_vm4, %v104_v50   ;;  %113 = vst.msk [vmem:[#allocation0 + $0x32] sm:$0xc0] %vm77_vm4, %v104_v50  }
  0x80   :  { %143 = vst.msk [vmem:[#allocation0] sm:$0x3] %vm142_vm5, %v141_v51   ;;  %145 = vst.msk [vmem:[#allocation0 + $0x6] sm:$0xc] %vm142_vm5, %v141_v51  }
  0x81   :  { %147 = vst.msk [vmem:[#allocation0 + $0xc] sm:$0x30] %vm142_vm5, %v141_v51   ;;  %149 = vst.msk [vmem:[#allocation0 + $0x12] sm:$0xc0] %vm142_vm5, %v141_v51  }
  0x82   :  { %v169_v52 = vpop.permute.xlu0 %168   ;;  %v183_v53 = vpop.permute.xlu1 %182  }
  0x83   :  { %172 = vst.msk [vmem:[#allocation0 + $0x20] sm:$0x3] %vm142_vm5, %v169_v52   ;;  %174 = vst.msk [vmem:[#allocation0 + $0x26] sm:$0xc] %vm142_vm5, %v169_v52  }
  0x84   :  { %176 = vst.msk [vmem:[#allocation0 + $0x2c] sm:$0x30] %vm142_vm5, %v169_v52   ;;  %178 = vst.msk [vmem:[#allocation0 + $0x32] sm:$0xc0] %vm142_vm5, %v169_v52  }
  0x85   :  { %186 = vst.msk [vmem:[#allocation0 + $0x40] sm:$0x3] %vm142_vm5, %v183_v53  }
  0x86   :  { %v206_v54 = vpop.permute.xlu0 %205  }
  0x87   :  { %208 = vst.msk [vmem:[#allocation0] sm:$0x3] %vm207_vm6, %v206_v54   ;;  %210 = vst.msk [vmem:[#allocation0 + $0x6] sm:$0xc] %vm207_vm6, %v206_v54   ;;  %v234_v55 = vpop.permute.xlu1 %233  }
  0x88   :  { %212 = vst.msk [vmem:[#allocation0 + $0xc] sm:$0x30] %vm207_vm6, %v206_v54   ;;  %214 = vst.msk [vmem:[#allocation0 + $0x12] sm:$0xc0] %vm207_vm6, %v206_v54  }
  0x89   :  { %237 = vst.msk [vmem:[#allocation0 + $0x20] sm:$0x3] %vm207_vm6, %v234_v55   ;;  %239 = vst.msk [vmem:[#allocation0 + $0x26] sm:$0xc] %vm207_vm6, %v234_v55  }
  0x8a   :  { %241 = vst.msk [vmem:[#allocation0 + $0x2c] sm:$0x30] %vm207_vm6, %v234_v55   ;;  %243 = vst.msk [vmem:[#allocation0 + $0x32] sm:$0xc0] %vm207_vm6, %v234_v55   ;;  %v248_v56 = vpop.permute.xlu0 %247  }
  0x8b   :  { %251 = vst.msk [vmem:[#allocation0 + $0x40] sm:$0x3] %vm207_vm6, %v248_v56   ;;  %v271_v57 = vpop.permute.xlu1 %270  }
  0x8c   :  { %273 = vst.msk [vmem:[#allocation0] sm:$0x3] %vm272_vm7, %v271_v57   ;;  %275 = vst.msk [vmem:[#allocation0 + $0x6] sm:$0xc] %vm272_vm7, %v271_v57  }
  0x8d   :  { %277 = vst.msk [vmem:[#allocation0 + $0xc] sm:$0x30] %vm272_vm7, %v271_v57   ;;  %279 = vst.msk [vmem:[#allocation0 + $0x12] sm:$0xc0] %vm272_vm7, %v271_v57  }
  0x8e   :  { %v299_v58 = vpop.permute.xlu0 %298  }
  0x8f   :  { %302 = vst.msk [vmem:[#allocation0 + $0x20] sm:$0x3] %vm272_vm7, %v299_v58   ;;  %304 = vst.msk [vmem:[#allocation0 + $0x26] sm:$0xc] %vm272_vm7, %v299_v58   ;;  %v313_v59 = vpop.permute.xlu1 %312  }
  0x90   :  { %306 = vst.msk [vmem:[#allocation0 + $0x2c] sm:$0x30] %vm272_vm7, %v299_v58   ;;  %308 = vst.msk [vmem:[#allocation0 + $0x32] sm:$0xc0] %vm272_vm7, %v299_v58  }
  0x91   :  { %316 = vst.msk [vmem:[#allocation0 + $0x40] sm:$0x3] %vm272_vm7, %v313_v59  }
  0x92   :  { %v336_v60 = vpop.permute.xlu0 %335  }
  0x93   :  { %338 = vst.msk [vmem:[#allocation0] sm:$0x3] %vm337_vm8, %v336_v60   ;;  %340 = vst.msk [vmem:[#allocation0 + $0x6] sm:$0xc] %vm337_vm8, %v336_v60   ;;  %v364_v61 = vpop.permute.xlu1 %363  }
  0x94   :  { %342 = vst.msk [vmem:[#allocation0 + $0xc] sm:$0x30] %vm337_vm8, %v336_v60   ;;  %344 = vst.msk [vmem:[#allocation0 + $0x12] sm:$0xc0] %vm337_vm8, %v336_v60  }
  0x95   :  { %367 = vst.msk [vmem:[#allocation0 + $0x20] sm:$0x3] %vm337_vm8, %v364_v61   ;;  %369 = vst.msk [vmem:[#allocation0 + $0x26] sm:$0xc] %vm337_vm8, %v364_v61  }
  0x96   :  { %371 = vst.msk [vmem:[#allocation0 + $0x2c] sm:$0x30] %vm337_vm8, %v364_v61   ;;  %373 = vst.msk [vmem:[#allocation0 + $0x32] sm:$0xc0] %vm337_vm8, %v364_v61   ;;  %v378_v62 = vpop.permute.xlu0 %377  }
  0x97   :  { %381 = vst.msk [vmem:[#allocation0 + $0x40] sm:$0x3] %vm337_vm8, %v378_v62   ;;  %v401_v63 = vpop.permute.xlu1 %400  }
  0x98   :  { %403 = vst.msk [vmem:[#allocation0] sm:$0x3] %vm402_vm9, %v401_v63   ;;  %405 = vst.msk [vmem:[#allocation0 + $0x6] sm:$0xc] %vm402_vm9, %v401_v63  }
  0x99   :  { %407 = vst.msk [vmem:[#allocation0 + $0xc] sm:$0x30] %vm402_vm9, %v401_v63   ;;  %409 = vst.msk [vmem:[#allocation0 + $0x12] sm:$0xc0] %vm402_vm9, %v401_v63  }
  0x9a   :  { %v429_v0 = vpop.permute.xlu0 %428  }
  0x9b   :  { %432 = vst.msk [vmem:[#allocation0 + $0x20] sm:$0x3] %vm402_vm9, %v429_v0   ;;  %434 = vst.msk [vmem:[#allocation0 + $0x26] sm:$0xc] %vm402_vm9, %v429_v0   ;;  %v443_v1 = vpop.permute.xlu1 %442  }
  0x9c   :  { %436 = vst.msk [vmem:[#allocation0 + $0x2c] sm:$0x30] %vm402_vm9, %v429_v0   ;;  %438 = vst.msk [vmem:[#allocation0 + $0x32] sm:$0xc0] %vm402_vm9, %v429_v0  }
  0x9d   :  { %446 = vst.msk [vmem:[#allocation0 + $0x40] sm:$0x3] %vm402_vm9, %v443_v1  }
  0x9e   :  { %v466_v2 = vpop.permute.xlu0 %465  }
  0x9f   :  { %468 = vst.msk [vmem:[#allocation0] sm:$0x3] %vm467_vm10, %v466_v2   ;;  %470 = vst.msk [vmem:[#allocation0 + $0x6] sm:$0xc] %vm467_vm10, %v466_v2   ;;  %v494_v3 = vpop.permute.xlu1 %493  }
  0xa0   :  { %472 = vst.msk [vmem:[#allocation0 + $0xc] sm:$0x30] %vm467_vm10, %v466_v2   ;;  %474 = vst.msk [vmem:[#allocation0 + $0x12] sm:$0xc0] %vm467_vm10, %v466_v2  }
  0xa1   :  { %497 = vst.msk [vmem:[#allocation0 + $0x20] sm:$0x3] %vm467_vm10, %v494_v3   ;;  %499 = vst.msk [vmem:[#allocation0 + $0x26] sm:$0xc] %vm467_vm10, %v494_v3  }
  0xa2   :  { %501 = vst.msk [vmem:[#allocation0 + $0x2c] sm:$0x30] %vm467_vm10, %v494_v3   ;;  %503 = vst.msk [vmem:[#allocation0 + $0x32] sm:$0xc0] %vm467_vm10, %v494_v3   ;;  %v508_v4 = vpop.permute.xlu0 %507  }
  0xa3   :  { %511 = vst.msk [vmem:[#allocation0 + $0x40] sm:$0x3] %vm467_vm10, %v508_v4   ;;  %v531_v5 = vpop.permute.xlu1 %530  }
  0xa4   :  { %533 = vst.msk [vmem:[#allocation0] sm:$0x3] %vm532_vm11, %v531_v5   ;;  %535 = vst.msk [vmem:[#allocation0 + $0x6] sm:$0xc] %vm532_vm11, %v531_v5  }
  0xa5   :  { %537 = vst.msk [vmem:[#allocation0 + $0xc] sm:$0x30] %vm532_vm11, %v531_v5   ;;  %539 = vst.msk [vmem:[#allocation0 + $0x12] sm:$0xc0] %vm532_vm11, %v531_v5  }
  0xa6   :  { %v559_v6 = vpop.permute.xlu0 %558  }
  0xa7   :  { %562 = vst.msk [vmem:[#allocation0 + $0x20] sm:$0x3] %vm532_vm11, %v559_v6   ;;  %564 = vst.msk [vmem:[#allocation0 + $0x26] sm:$0xc] %vm532_vm11, %v559_v6   ;;  %v573_v7 = vpop.permute.xlu1 %572  }
  0xa8   :  { %566 = vst.msk [vmem:[#allocation0 + $0x2c] sm:$0x30] %vm532_vm11, %v559_v6   ;;  %568 = vst.msk [vmem:[#allocation0 + $0x32] sm:$0xc0] %vm532_vm11, %v559_v6  }
  0xa9   :  { %576 = vst.msk [vmem:[#allocation0 + $0x40] sm:$0x3] %vm532_vm11, %v573_v7  }
  0xaa   :  { %v596_v8 = vpop.permute.xlu0 %595  }
  0xab   :  { %598 = vst.msk [vmem:[#allocation0] sm:$0x3] %vm597_vm12, %v596_v8   ;;  %600 = vst.msk [vmem:[#allocation0 + $0x6] sm:$0xc] %vm597_vm12, %v596_v8   ;;  %v624_v9 = vpop.permute.xlu1 %623  }
  0xac   :  { %602 = vst.msk [vmem:[#allocation0 + $0xc] sm:$0x30] %vm597_vm12, %v596_v8   ;;  %604 = vst.msk [vmem:[#allocation0 + $0x12] sm:$0xc0] %vm597_vm12, %v596_v8  }
  0xad   :  { %627 = vst.msk [vmem:[#allocation0 + $0x20] sm:$0x3] %vm597_vm12, %v624_v9   ;;  %629 = vst.msk [vmem:[#allocation0 + $0x26] sm:$0xc] %vm597_vm12, %v624_v9  }
  0xae   :  { %631 = vst.msk [vmem:[#allocation0 + $0x2c] sm:$0x30] %vm597_vm12, %v624_v9   ;;  %633 = vst.msk [vmem:[#allocation0 + $0x32] sm:$0xc0] %vm597_vm12, %v624_v9   ;;  %v638_v10 = vpop.permute.xlu0 %637  }
  0xaf   :  { %641 = vst.msk [vmem:[#allocation0 + $0x40] sm:$0x3] %vm597_vm12, %v638_v10   ;;  %v661_v11 = vpop.permute.xlu1 %660  }
  0xb0   :  { %663 = vst.msk [vmem:[#allocation0] sm:$0x3] %vm662_vm13, %v661_v11   ;;  %665 = vst.msk [vmem:[#allocation0 + $0x6] sm:$0xc] %vm662_vm13, %v661_v11  }
  0xb1   :  { %667 = vst.msk [vmem:[#allocation0 + $0xc] sm:$0x30] %vm662_vm13, %v661_v11   ;;  %669 = vst.msk [vmem:[#allocation0 + $0x12] sm:$0xc0] %vm662_vm13, %v661_v11  }
  0xb2   :  { %v689_v12 = vpop.permute.xlu0 %688  }
  0xb3   :  { %692 = vst.msk [vmem:[#allocation0 + $0x20] sm:$0x3] %vm662_vm13, %v689_v12   ;;  %694 = vst.msk [vmem:[#allocation0 + $0x26] sm:$0xc] %vm662_vm13, %v689_v12   ;;  %v703_v13 = vpop.permute.xlu1 %702  }
  0xb4   :  { %696 = vst.msk [vmem:[#allocation0 + $0x2c] sm:$0x30] %vm662_vm13, %v689_v12   ;;  %698 = vst.msk [vmem:[#allocation0 + $0x32] sm:$0xc0] %vm662_vm13, %v689_v12  }
  0xb5   :  { %706 = vst.msk [vmem:[#allocation0 + $0x40] sm:$0x3] %vm662_vm13, %v703_v13  }
  0xb6   :  { %v726_v14 = vpop.permute.xlu0 %725  }
  0xb7   :  { %728 = vst.msk [vmem:[#allocation0] sm:$0x3] %vm727_vm14, %v726_v14   ;;  %730 = vst.msk [vmem:[#allocation0 + $0x6] sm:$0xc] %vm727_vm14, %v726_v14   ;;  %v754_v15 = vpop.permute.xlu1 %753  }
  0xb8   :  { %732 = vst.msk [vmem:[#allocation0 + $0xc] sm:$0x30] %vm727_vm14, %v726_v14   ;;  %734 = vst.msk [vmem:[#allocation0 + $0x12] sm:$0xc0] %vm727_vm14, %v726_v14  }
  0xb9   :  { %757 = vst.msk [vmem:[#allocation0 + $0x20] sm:$0x3] %vm727_vm14, %v754_v15   ;;  %759 = vst.msk [vmem:[#allocation0 + $0x26] sm:$0xc] %vm727_vm14, %v754_v15  }
  0xba   :  { %761 = vst.msk [vmem:[#allocation0 + $0x2c] sm:$0x30] %vm727_vm14, %v754_v15   ;;  %763 = vst.msk [vmem:[#allocation0 + $0x32] sm:$0xc0] %vm727_vm14, %v754_v15   ;;  %v768_v16 = vpop.permute.xlu0 %767  }
  0xbb   :  { %771 = vst.msk [vmem:[#allocation0 + $0x40] sm:$0x3] %vm727_vm14, %v768_v16   ;;  %v791_v17 = vpop.permute.xlu1 %790  }
  0xbc   :  { %793 = vst.msk [vmem:[#allocation0] sm:$0x3] %vm792_vm15, %v791_v17   ;;  %795 = vst.msk [vmem:[#allocation0 + $0x6] sm:$0xc] %vm792_vm15, %v791_v17  }
  0xbd   :  { %797 = vst.msk [vmem:[#allocation0 + $0xc] sm:$0x30] %vm792_vm15, %v791_v17   ;;  %799 = vst.msk [vmem:[#allocation0 + $0x12] sm:$0xc0] %vm792_vm15, %v791_v17  }
  0xbe   :  { %v819_v18 = vpop.permute.xlu0 %818  }
  0xbf   :  { %822 = vst.msk [vmem:[#allocation0 + $0x20] sm:$0x3] %vm792_vm15, %v819_v18   ;;  %824 = vst.msk [vmem:[#allocation0 + $0x26] sm:$0xc] %vm792_vm15, %v819_v18   ;;  %v833_v19 = vpop.permute.xlu1 %832  }
  0xc0   :  { %826 = vst.msk [vmem:[#allocation0 + $0x2c] sm:$0x30] %vm792_vm15, %v819_v18   ;;  %828 = vst.msk [vmem:[#allocation0 + $0x32] sm:$0xc0] %vm792_vm15, %v819_v18  }
  0xc1   :  { %836 = vst.msk [vmem:[#allocation0 + $0x40] sm:$0x3] %vm792_vm15, %v833_v19  }
  0xc2   :  { %v856_v20 = vpop.permute.xlu0 %855  }
  0xc3   :  { %858 = vst.msk [vmem:[#allocation0] sm:$0x3] %vm857_vm0, %v856_v20   ;;  %860 = vst.msk [vmem:[#allocation0 + $0x6] sm:$0xc] %vm857_vm0, %v856_v20   ;;  %v884_v21 = vpop.permute.xlu1 %883  }
  0xc4   :  { %862 = vst.msk [vmem:[#allocation0 + $0xc] sm:$0x30] %vm857_vm0, %v856_v20   ;;  %864 = vst.msk [vmem:[#allocation0 + $0x12] sm:$0xc0] %vm857_vm0, %v856_v20  }
  0xc5   :  { %887 = vst.msk [vmem:[#allocation0 + $0x20] sm:$0x3] %vm857_vm0, %v884_v21   ;;  %889 = vst.msk [vmem:[#allocation0 + $0x26] sm:$0xc] %vm857_vm0, %v884_v21  }
  0xc6   :  { %891 = vst.msk [vmem:[#allocation0 + $0x2c] sm:$0x30] %vm857_vm0, %v884_v21   ;;  %893 = vst.msk [vmem:[#allocation0 + $0x32] sm:$0xc0] %vm857_vm0, %v884_v21   ;;  %v898_v22 = vpop.permute.xlu0 %897  }
  0xc7   :  { %901 = vst.msk [vmem:[#allocation0 + $0x40] sm:$0x3] %vm857_vm0, %v898_v22   ;;  %v921_v23 = vpop.permute.xlu1 %920  }
  0xc8   :  { %923 = vst.msk [vmem:[#allocation0] sm:$0x3] %vm922_vm1, %v921_v23   ;;  %925 = vst.msk [vmem:[#allocation0 + $0x6] sm:$0xc] %vm922_vm1, %v921_v23  }
  0xc9   :  { %927 = vst.msk [vmem:[#allocation0 + $0xc] sm:$0x30] %vm922_vm1, %v921_v23   ;;  %929 = vst.msk [vmem:[#allocation0 + $0x12] sm:$0xc0] %vm922_vm1, %v921_v23  }
  0xca   :  { %v949_v24 = vpop.permute.xlu0 %948  }
  0xcb   :  { %952 = vst.msk [vmem:[#allocation0 + $0x20] sm:$0x3] %vm922_vm1, %v949_v24   ;;  %954 = vst.msk [vmem:[#allocation0 + $0x26] sm:$0xc] %vm922_vm1, %v949_v24   ;;  %v963_v25 = vpop.permute.xlu1 %962  }
  0xcc   :  { %956 = vst.msk [vmem:[#allocation0 + $0x2c] sm:$0x30] %vm922_vm1, %v949_v24   ;;  %958 = vst.msk [vmem:[#allocation0 + $0x32] sm:$0xc0] %vm922_vm1, %v949_v24  }
  0xcd   :  { %966 = vst.msk [vmem:[#allocation0 + $0x40] sm:$0x3] %vm922_vm1, %v963_v25  }
  0xce   :  { %v986_v26 = vpop.permute.xlu0 %985  }
  0xcf   :  { %988 = vst.msk [vmem:[#allocation0] sm:$0x3] %vm987_vm2, %v986_v26   ;;  %990 = vst.msk [vmem:[#allocation0 + $0x6] sm:$0xc] %vm987_vm2, %v986_v26   ;;  %v1014_v27 = vpop.permute.xlu1 %1013  }
  0xd0   :  { %992 = vst.msk [vmem:[#allocation0 + $0xc] sm:$0x30] %vm987_vm2, %v986_v26   ;;  %994 = vst.msk [vmem:[#allocation0 + $0x12] sm:$0xc0] %vm987_vm2, %v986_v26  }
  0xd1   :  { %1017 = vst.msk [vmem:[#allocation0 + $0x20] sm:$0x3] %vm987_vm2, %v1014_v27   ;;  %1019 = vst.msk [vmem:[#allocation0 + $0x26] sm:$0xc] %vm987_vm2, %v1014_v27  }
  0xd2   :  { %1021 = vst.msk [vmem:[#allocation0 + $0x2c] sm:$0x30] %vm987_vm2, %v1014_v27   ;;  %1023 = vst.msk [vmem:[#allocation0 + $0x32] sm:$0xc0] %vm987_vm2, %v1014_v27   ;;  %v1028_v28 = vpop.permute.xlu0 %1027  }
  0xd3   :  { %1031 = vst.msk [vmem:[#allocation0 + $0x40] sm:$0x3] %vm987_vm2, %v1028_v28  }
  0xd6   :  { %v1035_v29 = vld [vmem:[#allocation0] sm:$0x3]  ;;  %v1039_v30 = vld [vmem:[#allocation0 + $0x8] sm:$0x3] }
  0xd7   :  { %v1044_v31 = vld [vmem:[#allocation0 + $0x10] sm:$0x3]  ;;  %1037 = vst [vmem:[%s1854_s1] sm:$0x3] %v1035_v29  ;;  %1232 = vst [vmem:[%s1854_s1 + $0x2] sm:$0x3] %v1039_v30 }
  0xd8   :  { %1233 = vst [vmem:[%s1854_s1 + $0x4] sm:$0x3] %v1044_v31  ;;  %v1050_v32 = vld [vmem:[#allocation0 + $0x18] sm:$0x3]  ;;  %v1056_v33 = vld [vmem:[#allocation0 + $0x20] sm:$0x3] }
  0xd9   :  { %1234 = vst [vmem:[%s1854_s1 + $0x6] sm:$0x3] %v1050_v32  ;;  %v1062_v34 = vld [vmem:[#allocation0 + $0x28] sm:$0x3]  ;;  %v1068_v35 = vld [vmem:[#allocation0 + $0x30] sm:$0x3] }
  0xda   :  { %1235 = vst [vmem:[%s1854_s1 + $0x8] sm:$0x3] %v1056_v33  ;;  %1236 = vst [vmem:[%s1854_s1 + $0xa] sm:$0x3] %v1062_v34  ;;  %v1074_v36 = vld [vmem:[#allocation0 + $0x38] sm:$0x3] }
  0xdb   :  { %1237 = vst [vmem:[%s1854_s1 + $0xc] sm:$0x3] %v1068_v35  ;;  %1238 = vst [vmem:[%s1854_s1 + $0xe] sm:$0x3] %v1074_v36  ;;  %v1080_v37 = vld [vmem:[#allocation0 + $0x40] sm:$0x3] }
  0xdc   :  { %1239 = vst [vmem:[%s1854_s1 + $0x10] sm:$0x3] %v1080_v37 }

// kernel: upsample_rcp.1
= control target key start
LH: loop header
LB: loop body
LE: loop exit
PB: predicated region body
PF: predicated region fallthrough
CT: control target
= control target key end

     0   :  { %8 = vsyncpa [#allocation3], 0  ;;  %s1293_s0 = inlined_call_operand.vmem [shape: f32[2,18,36], index: 0, kind: input, shape index: {}]   ;;  %s1294_s1 = inlined_call_operand.vmem [shape: f32[2,3,3,32], index: 1, kind: input, shape index: {}]   ;;  %s1295_s2 = inlined_call_operand.vmem [shape: f32[2,32], index: 2, kind: input, shape index: {}]   ;;  %s1296_s3 = inlined_call_operand.hbm [shape: f32[2,16,2,32], index: 3, kind: output, shape index: {}]  }
   0x1   :  { %10 = vsyncpa [#allocation3 + $0x1], 0  ;;  %s972_s12 = smov 0   ;;  %s974_s13 = smov 0  }
   0x2   :  { %s976_s14 = smov 0   ;;  %s978_s15 = smov 0  }
   0x3   :  { %s980_s16 = smov 0   ;;  %s982_s17 = smov 0  }
   0x4   :  { %s984_s18 = smov 0   ;;  %s986_s19 = smov 0  }
   0x5 LB: > { %s722_s20 = sadd.s32 4294967295, %s943_s19   ;;  %s723_s21 = sadd.s32 4294967294, %s943_s19   ;;  %s943_s19 = sphi %s986_s19, %s16_s19   ;;  %s939_s18 = sphi %s984_s18, %s1305_s18   ;;  %s935_s17 = sphi %s982_s17, %s1304_s17   ;;  %s931_s16 = sphi %s980_s16, %s1303_s16   ;;  %s927_s15 = sphi %s978_s15, %s1302_s15   ;;  %s923_s14 = sphi %s976_s14, %s1301_s14   ;;  %s919_s13 = sphi %s974_s13, %s1300_s13   ;;  %s915_s12 = sphi %s972_s12, %s1299_s12  }
   0x6   : > { %s25_s22 = sadd.s32 1, %s935_s17  ;;  %s28_s23 = sadd.s32 1, %s939_s18 }
   0x7   : > { %p26_p0 = scmp.ge.s32.totalorder %s25_s22, 2  ;;  %p115_p1 = scmp.ne.s32.totalorder %s923_s14, %s919_s13 }
   0x8   : > { %p116_p2 = scmp.eq.s32.totalorder %s722_s20, 3  ;;  %p121_p5 = scmp.ne.s32.totalorder %s919_s13, %s915_s12 }
   0x9   : > { %s1307_s22 = smov (%p26_p0, %s25_s22), 0  ;;  %s1309_s23 = smov (!%p26_p0, %s28_s23), %s939_s18 }
   0xa   : > { %s101_s24 = ssub.s32 %s935_s17, %s1307_s22  ;;  %p1023_p3 = por %p116_p2, %p115_p1 }
   0xb   : > { %p30_p4 = scmp.ge.s32.totalorder %s1309_s23, 2  ;;  %p122_p6 = scmp.eq.s32.totalorder %s723_s21, 3 }
   0xc   : > { %p726_p7 = scmp.ge.s32.totalorder %s943_s19, 1  ;;  %p154_p9 = scmp.lt.s32.totalorder %s943_s19, 5 }
   0xd   : > { %s1311_s23 = smov (%p30_p4, %s1309_s23), 0  ;;  %p1032_p8 = por %p122_p6, %p121_p5 }
   0xe   : > { %s100_s27 = ssub.s32 %s939_s18, %s1311_s23  ;;  %s105_s28 = sadd.s32 1, %s923_s14 }
   0xf   : > { %s102_s29 = sor.u32 %s101_s24, %s100_s27  ;;  %p155_p10 = pnand %p726_p7, %p154_p9 }
  0x10   : > { %p103_p11 = scmp.eq.s32.totalorder %s102_s29, 0  ;;  %v731_v0 = vld [vmem:[%s1294_s1 + $0x1] ss:$0 sm:$0xff] (!%p155_p10)  ;;  %v732_v1 = vld [vmem:[%s1294_s1 + $0x2] ss:$0 sm:$0xff] (!%p155_p10)  ;;  %s945_s8 = smov (!%p155_p10), 2  }
  0x11   : > { %158 = sbr.rel (%p155_p10) target bundleno = 304 (0x130), region = 32  ;;  %200 = vrot.lane.b32.xlu0 (!%p155_p10), %v731_v0, %s945_s8  ;;  %s946_s9 = smov (!%p155_p10), 4   ;;  %v749_v2 = vld [vmem:[%s1294_s1 + $0xd] ss:$0 sm:$0xff] (!%p155_p10)  ;;  %v751_v3 = vld [vmem:[%s1294_s1 + $0xe] ss:$0 sm:$0xff] (!%p155_p10) }
  0x12   : > { %s1041_s30 = scalar_select %p103_p11, %s923_s14, %s105_s28  }
  0x13   : > { %215 = vrot.lane.b32.xlu1 (!%p155_p10), %v732_v1, %s946_s9  ;;  %v736_v4 = vld [vmem:[%s1294_s1 + $0x5] ss:$0 sm:$0xff] (!%p155_p10)  ;;  %v755_v5 = vld [vmem:[%s1294_s1 + $0x11] ss:$0 sm:$0xff] (!%p155_p10)  ;;  %v738_v6 = vld [vmem:[%s1294_s1 + $0x6] ss:$0 sm:$0xff] (!%p155_p10) }
  0x14   : > { %v757_v7 = vld [vmem:[%s1294_s1 + $0x12] ss:$0 sm:$0xff] (!%p155_p10)  ;;  %v742_v8 = vld [vmem:[%s1294_s1 + $0x9] ss:$0 sm:$0xff] (!%p155_p10)  ;;  %v761_v9 = vld [vmem:[%s1294_s1 + $0x15] ss:$0 sm:$0xff] (!%p155_p10) }
  0x15   : > { %422 = vrot.lane.b32.xlu0 (!%p155_p10), %v749_v2, %s945_s8  ;;  %v744_v10 = vld [vmem:[%s1294_s1 + $0xa] ss:$0 sm:$0xff] (!%p155_p10)  ;;  %v763_v11 = vld [vmem:[%s1294_s1 + $0x16] ss:$0 sm:$0xff] (!%p155_p10)  ;;  %p178_p12 = scmp.lt.s32.totalorder (!%p155_p10), %s931_s16, 1  ;;  %s729_s11 = sshll.u32 (!%p155_p10), %s927_s15, 3 }
  0x16   : > { %v734_v14 = vld [vmem:[%s1294_s1 + $0x4] ss:$0 sm:$0xff] (!%p155_p10)  ;;  %vm234_vm0 = vcmask (!%p155_p10), 1046528   ;;  %v753_v19 = vld [vmem:[%s1294_s1 + $0x10] ss:$0 sm:$0xff] (!%p155_p10)  ;;  %vm290_vm1 = vcmask (!%p155_p10), 1045504  }
  0x17   : > { %437 = vrot.lane.b32.xlu1 (!%p155_p10), %v751_v3, %s946_s9  ;;  %v740_v29 = vld [vmem:[%s1294_s1 + $0x8] ss:$0 sm:$0xff] (!%p155_p10)  ;;  %v759_v32 = vld [vmem:[%s1294_s1 + $0x14] ss:$0 sm:$0xff] (!%p155_p10)  ;;  %s948_s7 = smov (!%p155_p10), 124   ;;  %s175_s28 = sand.u32 (!%p155_p10), 1, %s919_s13  }
  0x18   : > { %s179_s4 = scalar_select %p178_p12, %s931_s16, 1  ;;  %vm400_vm2 = vcmask 253952  }
  0x19   : > { %246 = vrot.lane.b32.xlu0 %v736_v4, %s945_s8  ;;  %s767_s6 = sshll.u32 %s931_s16, 4  ;;  %s1240_s24 = scalar_lea.sflag [#allocation3], %s175_s28 }
  0x1a   : > { %s771_s5 = smul.u32 24, %s179_s4  ;;  %s947_s4 = smov 126  }
  0x1b   : > { %467 = vrot.lane.b32.xlu1 %v755_v5, %s945_s8  ;;  %s950_s27 = smov [#allocation2]  }
  0x1c   : > { %s182_s10 = scalar_lea.vmem %s1293_s0, %s771_s5  ;;  %s727_s5 = sshll.u32 %s175_s28, 4 }
  0x1d   : > { %266 = vrot.lane.b32.xlu0 %v738_v6, %s946_s9  ;;  %s185_s20 = scalar_lea.vmem %s182_s10, %s729_s11  ;;  %s1195_s16 = scalar_lea.vmem [#allocation2], %s727_s5 }
  0x1e   : > { %v1093_v12 = vld [vmem:[%s185_s20] sm:$0xff]  ;;  %v1095_v13 = vld [vmem:[%s185_s20 + $0x8] sm:$0x3]  ;;  %s853_s29 = sshll.u32 %s950_s27, 4  ;;  %s854_s29 = int_to_ptr.vmem [resolvable:$false] %s853_s29 }
  0x1f   : > { %487 = vrot.lane.b32.xlu1 %v757_v7, %s946_s9  ;;  %v230_v15 = vmul.f32 %v734_v14, %v1093_v12  ;;  %v231_v16 = vmul.f32 %v734_v14, %v1095_v13  ;;  %v452_v21 = vmul.f32 %v753_v19, %v1093_v12  ;;  %v453_v22 = vmul.f32 %v753_v19, %v1095_v13 }
  0x20   : > { %v286_v30 = vmul.f32 %v740_v29, %v1093_v12  ;;  %v287_v31 = vmul.f32 %v740_v29, %v1095_v13  ;;  %v507_v35 = vmul.f32 %v759_v32, %v1093_v12  ;;  %v508_v36 = vmul.f32 %v759_v32, %v1095_v13 }
  0x21   : > { %302 = vrot.lane.b32.xlu0 %v742_v8, %s945_s8  ;;  %v235_v17 = vrot.slane %v230_v15, 1  ;;  %v236_v18 = vrot.slane %v231_v16, 1  ;;  %v456_v23 = vrot.slane %v452_v21, 1  ;;  %v457_v24 = vrot.slane %v453_v22, 1 }
  0x22   : > { %v291_v39 = vrot.slane %v286_v30, 2  ;;  %v292_v40 = vrot.slane %v287_v31, 2  ;;  %v511_v41 = vrot.slane %v507_v35, 2  ;;  %v512_v42 = vrot.slane %v508_v36, 2  ;;  %v747_v36 = vld [vmem:[%s1294_s1 + $0xc] ss:$0 sm:$0xff] }
  0x23   : > { %522 = vrot.lane.b32.xlu1 %v761_v9, %s945_s8  ;;  %v1106_v20 = vsel %vm234_vm0, %v235_v17, %v236_v18  ;;  %v1111_v27 = vsel %vm234_vm0, %v456_v23, %v457_v24 }
  0x24   : > { %v1130_v43 = vsel %vm290_vm1, %v291_v39, %v292_v40  ;;  %v1134_v47 = vsel %vm290_vm1, %v511_v41, %v512_v42 }
  0x25   : > { %322 = vrot.lane.b32.xlu0 %v744_v10, %s946_s9 }
  0x27   : > { %542 = vrot.lane.b32.xlu1 %v763_v11, %s946_s9 }
  0x83   : > { %v201_v25 = vpop.permute.xlu0 %200 }
  0x84   : > { %v203_v28 = vmul.f32 %v201_v25, %v1093_v12 }
  0x85   : > { %v216_v26 = vpop.permute.xlu1 %215 }
  0x86   : > { %205 = vrot.lane.b32.xlu0 %v203_v28, %s947_s4  ;;  %v218_v37 = vmul.f32 %v216_v26, %v1093_v12 }
  0x87   : > { %v423_v33 = vpop.permute.xlu0 %422 }
  0x88   : > { %v425_v38 = vmul.f32 %v423_v33, %v1093_v12 }
  0x89   : > { %v438_v34 = vpop.permute.xlu1 %437 }
  0x8a   : > { %427 = vrot.lane.b32.xlu1 %v425_v38, %s947_s4  ;;  %220 = vrot.lane.b32.xlu0 %v218_v37, %s948_s7  ;;  %v440_v44 = vmul.f32 %v438_v34, %v1093_v12  ;;  %v415_v38 = vmul.f32 %v747_v36, %v1093_v12 }
  0x8b   : > { %v247_v45 = vpop.permute.xlu0 %246 }
  0x8c   : > { %v249_v48 = vmul.f32 %v247_v45, %v1093_v12  ;;  %v250_v49 = vmul.f32 %v247_v45, %v1095_v13 }
  0x8d   : > { %v468_v46 = vpop.permute.xlu1 %467 }
  0x8e   : > { %v470_v50 = vmul.f32 %v468_v46, %v1093_v12  ;;  %v471_v51 = vmul.f32 %v468_v46, %v1095_v13  ;;  %v253_v52 = vrot.slane %v249_v48, 1  ;;  %v254_v53 = vrot.slane %v250_v49, 1  ;;  %442 = vrot.lane.b32.xlu1 %v440_v44, %s948_s7 }
  0x8f   : > { %v267_v56 = vpop.permute.xlu0 %266 }
  0x90   : > { %v474_v54 = vrot.slane %v470_v50, 1  ;;  %v475_v55 = vrot.slane %v471_v51, 1  ;;  %v269_v58 = vmul.f32 %v267_v56, %v1093_v12  ;;  %v270_v59 = vmul.f32 %v267_v56, %v1095_v13 }
  0x91   : > { %v488_v57 = vpop.permute.xlu1 %487  ;;  %v255_v62 = vsel %vm234_vm0, %v253_v52, %v254_v53 }
  0x92   : > { %v490_v60 = vmul.f32 %v488_v57, %v1093_v12  ;;  %v491_v61 = vmul.f32 %v488_v57, %v1095_v13  ;;  %v476_v63 = vsel %vm234_vm0, %v474_v54, %v475_v55  ;;  %v273_v0 = vrot.slane %v269_v58, 1  ;;  %256 = vrot.lane.b32.xlu0 %v255_v62, %s947_s4 }
  0x93   : > { %v274_v1 = vrot.slane %v270_v59, 1  ;;  %477 = vrot.lane.b32.xlu1 %v476_v63, %s947_s4  ;;  %v303_v4 = vpop.permute.xlu0 %302  ;;  %v347_v58 = vlaneseq }
  0x94   : > { %v494_v2 = vrot.slane %v490_v60, 1  ;;  %v495_v3 = vrot.slane %v491_v61, 1  ;;  %v305_v6 = vmul.f32 %v303_v4, %v1093_v12  ;;  %v306_v7 = vmul.f32 %v303_v4, %v1095_v13 }
  0x95   : > { %v523_v5 = vpop.permute.xlu1 %522  ;;  %v275_v10 = vsel %vm234_vm0, %v273_v0, %v274_v1  ;;  %v348_v62 = vshrl.u32 %v347_v58, 7  ;;  %v745_v1 = vld [vmem:[%s1295_s2] ss:$0 sm:$0xff] }
  0x96   : > { %v525_v8 = vmul.f32 %v523_v5, %v1093_v12  ;;  %v526_v9 = vmul.f32 %v523_v5, %v1095_v13  ;;  %v496_v11 = vsel %vm234_vm0, %v494_v2, %v495_v3  ;;  %v309_v14 = vrot.slane %v305_v6, 2  ;;  %276 = vrot.lane.b32.xlu0 %v275_v10, %s948_s7 }
  0x97   : > { %v310_v15 = vrot.slane %v306_v7, 2  ;;  %497 = vrot.lane.b32.xlu1 %v496_v11, %s948_s7  ;;  %v323_v18 = vpop.permute.xlu0 %322 }
  0x98   : > { %v529_v16 = vrot.slane %v525_v8, 2  ;;  %v530_v17 = vrot.slane %v526_v9, 2  ;;  %v325_v21 = vmul.f32 %v323_v18, %v1093_v12  ;;  %v326_v22 = vmul.f32 %v323_v18, %v1095_v13 }
  0x99   : > { %v543_v19 = vpop.permute.xlu1 %542  ;;  %v311_v25 = vsel %vm290_vm1, %v309_v14, %v310_v15 }
  0x9a   : > { %v545_v23 = vmul.f32 %v543_v19, %v1093_v12  ;;  %v546_v24 = vmul.f32 %v543_v19, %v1095_v13  ;;  %v531_v26 = vsel %vm290_vm1, %v529_v16, %v530_v17  ;;  %v329_v28 = vrot.slane %v325_v21, 2  ;;  %312 = vrot.lane.b32.xlu0 %v311_v25, %s947_s4  ;;  %v730_v13 = vld [vmem:[%s1294_s1] ss:$0 sm:$0xff] }
  0x9b   : > { %v330_v29 = vrot.slane %v326_v22, 2  ;;  %532 = vrot.lane.b32.xlu1 %v531_v26, %s947_s4  ;;  %v193_v34 = vmul.f32 %v730_v13, %v1093_v12  ;;  %v949_v12 = vmov 1966171168   ;;  %s855_s4 = scalar_lea.vmem %s854_s29, 512 }
  0x9c   : > { %v549_v30 = vrot.slane %v545_v23, 2  ;;  %v550_v31 = vrot.slane %v546_v24, 2  ;;  %v345_v57 = vunpack.c.l.s4 %v949_v12 }
  0x9d   : > { %v331_v32 = vsel %vm290_vm1, %v329_v28, %v330_v29 }
  0x9e   : > { %v551_v33 = vsel %vm290_vm1, %v549_v30, %v550_v31  ;;  %332 = vrot.lane.b32.xlu0 %v331_v32, %s948_s7 }
  0x9f   : > { %552 = vrot.lane.b32.xlu1 %v551_v33, %s948_s7  ;;  %s1193_s7 = sadd.s32 %s767_s6, %s729_s11  ;;  %s644_s11 = sshll.u32 %s1195_s16, 4  ;;  %s1232_s11 = int_to_ptr.vmem [resolvable:$true] %s644_s11 }
  0xa0   : > { %s768_s15 = sshll.u32 %s1193_s7, 5  ;;  %s849_s9 = scalar_lea.vmem %s1232_s11, 256 }
  0xa1   : > { %s1218_s21 = scalar_lea.hbm %s1296_s3, %s768_s15  ;;  %p850_p13 = scmp.ne.s32.totalorder %s1232_s11, %s849_s9 }
  0xa2   : > { %p856_p2 = scmp.lt.s32.totalorder %s1232_s11, %s854_s29  ;;  %p857_p4 = scmp.lt.s32.totalorder %s855_s4, %s849_s9 }
  0xa3   : > { %p851_p0 = pnand %p850_p13, %p1023_p3 }
  0xa4   : > { %p858_p5 = por %p857_p4, %p856_p2 }
  0xa5   : > { %p852_p1 = pneg %p851_p0 }
  0xa7   : > { %p859_p6 = pnand %p858_p5, %p852_p1 }
  0xf8   : > { %v206_v35 = vpop.permute.xlu0 %205 }
  0xf9   : > { %v208_v37 = vadd.f32 %v206_v35, %v193_v34 }
  0xfc   : > { %v428_v39 = vpop.permute.xlu1 %427  ;;  %v221_v40 = vpop.permute.xlu0 %220 }
  0xfd   : > { %v223_v41 = vadd.f32 %v221_v40, %v208_v37  ;;  %v430_v42 = vadd.f32 %v428_v39, %v415_v38 }
  0xff   : > { %v239_v44 = vadd.f32 %v1106_v20, %v223_v41 }
 0x100   : > { %v443_v45 = vpop.permute.xlu1 %442 }
 0x101   : > { %v445_v46 = vadd.f32 %v443_v45, %v430_v42 }
 0x103   : > { %v460_v48 = vadd.f32 %v1111_v27, %v445_v46  ;;  %v346_v27 = vunpack.c.0.s8 %v345_v57 }
 0x104   : > { %v257_v49 = vpop.permute.xlu0 %256 }
 0x105   : > { %v478_v50 = vpop.permute.xlu1 %477  ;;  %v259_v51 = vadd.f32 %v257_v49, %v239_v44 }
 0x106   : > { %v480_v52 = vadd.f32 %v478_v50, %v460_v48 }
 0x108   : > { %v277_v53 = vpop.permute.xlu0 %276 }
 0x109   : > { %v498_v54 = vpop.permute.xlu1 %497  ;;  %v279_v55 = vadd.f32 %v277_v53, %v259_v51 }
 0x10a   : > { %v500_v56 = vadd.f32 %v498_v54, %v480_v52 }
 0x10b   : > { %v295_v59 = vadd.f32 %v1130_v43, %v279_v55  ;;  %v764_v43 = vld [vmem:[%s1295_s2 + $0x1] ss:$0 sm:$0xff] }
 0x10c   : > { %v515_v20 = vadd.f32 %v1134_v47, %v500_v56  ;;  %v313_v60 = vpop.permute.xlu0 %312  ;;  %v349_v47 = vsub.s32 %v346_v27, %v348_v62 }
 0x10d   : > { %v533_v61 = vpop.permute.xlu1 %532  ;;  %v315_v63 = vadd.f32 %v313_v60, %v295_v59 }
 0x10e   : > { %v535_v0 = vadd.f32 %v533_v61, %v515_v20 }
 0x110   : > { %v333_v2 = vpop.permute.xlu0 %332 }
 0x111   : > { %v553_v3 = vpop.permute.xlu1 %552  ;;  %v335_v4 = vadd.f32 %v333_v2, %v315_v63 }
 0x112   : > { %v555_v5 = vadd.f32 %v553_v3, %v535_v0 }
 0x113   : > { %v341_v6 = vadd.f32 %v745_v1, %v335_v4 }
 0x114   : > { %v561_v7 = vadd.f32 %v764_v43, %v555_v5 }
 0x115   : > { %v343_v8 = vcombine.high %v341_v6, %v341_v6  ;;  %v350_v9 = vrot.slane %v341_v6, %v349_v47 }
 0x116   : > { %v563_v10 = vcombine.high %v561_v7, %v561_v7  ;;  %v570_v11 = vrot.slane %v561_v7, %v349_v47 }
 0x117   : > { %v357_v14 = vrot.slane %v343_v8, %v349_v47  ;;  %v358_v15 = vcombine.high %v350_v9, %v350_v9  ;;  %v366_v16 = vrot.slane %v350_v9, %v349_v47 }
 0x118   : > { %v577_v17 = vrot.slane %v563_v10, %v349_v47  ;;  %v578_v18 = vcombine.high %v570_v11, %v570_v11  ;;  %v586_v19 = vrot.slane %v570_v11, %v349_v47 }
 0x119   : > { %v359_v21 = vcombine.high %v357_v14, %v357_v14  ;;  %v373_v22 = vrot.slane %v357_v14, %v349_v47  ;;  %v380_v23 = vrot.slane %v358_v15, %v349_v47  ;;  %v388_v24 = vcombine.high %v366_v16, %v366_v16  ;;  %401 = vst.msk [vmem:[%s1195_s16] sm:$0x1] %vm400_vm2, %v366_v16 }
 0x11a   : > { %v579_v25 = vcombine.high %v577_v17, %v577_v17  ;;  %v593_v26 = vrot.slane %v577_v17, %v349_v47  ;;  %v600_v28 = vrot.slane %v578_v18, %v349_v47  ;;  %v608_v29 = vcombine.high %v586_v19, %v586_v19  ;;  %620 = vst.msk [vmem:[%s1195_s16 + $0x1] sm:$0x1] %vm400_vm2, %v586_v19 }
 0x11b   : > { %v387_v30 = vrot.slane %v359_v21, %v349_v47  ;;  %v389_v31 = vcombine.high %v373_v22, %v373_v22  ;;  %v390_v32 = vcombine.high %v380_v23, %v380_v23  ;;  %402 = vst.msk [vmem:[%s1195_s16 + $0x2] sm:$0x1] %vm400_vm2, %v380_v23  ;;  %403 = vst.msk [vmem:[%s1195_s16 + $0x4] sm:$0x1] %vm400_vm2, %v388_v24 }
 0x11c   : > { %405 = vst.msk [vmem:[%s1195_s16 + $0x8] sm:$0x1] %vm400_vm2, %v373_v22  ;;  %v607_v33 = vrot.slane %v579_v25, %v349_v47  ;;  %v609_v13 = vcombine.high %v593_v26, %v593_v26  ;;  %v610_v34 = vcombine.high %v600_v28, %v600_v28  ;;  %621 = vst.msk [vmem:[%s1195_s16 + $0x3] sm:$0x1] %vm400_vm2, %v600_v28 }
 0x11d   : > { %622 = vst.msk [vmem:[%s1195_s16 + $0x5] sm:$0x1] %vm400_vm2, %v608_v29  ;;  %624 = vst.msk [vmem:[%s1195_s16 + $0x9] sm:$0x1] %vm400_vm2, %v593_v26  ;;  %v391_v35 = vcombine.high %v387_v30, %v387_v30 }
 0x11e   : > { %404 = vst.msk [vmem:[%s1195_s16 + $0x6] sm:$0x1] %vm400_vm2, %v390_v32  ;;  %406 = vst.msk [vmem:[%s1195_s16 + $0xa] sm:$0x1] %vm400_vm2, %v387_v30  ;;  %v611_v36 = vcombine.high %v607_v33, %v607_v33 }
 0x11f   : > { %407 = vst.msk [vmem:[%s1195_s16 + $0xc] sm:$0x1] %vm400_vm2, %v389_v31  ;;  %623 = vst.msk [vmem:[%s1195_s16 + $0x7] sm:$0x1] %vm400_vm2, %v610_v34 }
 0x120   : > { %625 = vst.msk [vmem:[%s1195_s16 + $0xb] sm:$0x1] %vm400_vm2, %v607_v33  ;;  %626 = vst.msk [vmem:[%s1195_s16 + $0xd] sm:$0x1] %vm400_vm2, %v609_v13 }
 0x121   : > { %408 = vst.msk [vmem:[%s1195_s16 + $0xe] sm:$0x1] %vm400_vm2, %v391_v35  ;;  %627 = vst.msk [vmem:[%s1195_s16 + $0xf] sm:$0x1] %vm400_vm2, %v611_v36 }
 0x122   : > { %862 = shalt.err (!%p859_p6)
}
 0x123   : > { %s863_s28 = scalar_lea.hbm %s1218_s21, 256  ;;  %s867_s7 = scalar_lea.hbm %s1296_s3, 1024 }
 0x124   : > { %p864_p7 = scmp.ne.s32.totalorder %s1218_s21, %s863_s28  ;;  %p868_p11 = scmp.lt.u32.totalorder %s1218_s21, %s1296_s3 }
 0x125   : > { %p869_p12 = scmp.lt.u32.totalorder %s867_s7, %s863_s28  ;;  %p871_p0 = scmp.lt.u32.totalorder %s863_s28, %s1218_s21 }
 0x126   : > { %p865_p9 = pnand %p864_p7, %p1023_p3 }
 0x127   : > { %p870_p13 = por %p869_p12, %p868_p11 }
 0x128   : > { %p866_p10 = pneg %p865_p9 }
 0x129   : > { %p872_p1 = por %p871_p0, %p870_p13 }
 0x12b   : > { %p873_p2 = pnand %p872_p1, %p866_p10 }
 0x12d   : > { %876 = shalt.err (!%p873_p2)
}
 0x12e   : > { %s951_s10 = smov 32  }
 0x12f   : > { %772 = dma.vmem_to_hbm [thread:$0]  (%p1023_p3), %s1232_s11, 256, %s1218_s21, %s1240_s24, %s951_s10, %s951_s10, %s945_s8  }
 0x130 PF: > { %p778_p4 = scmp.ge.s32.totalorder %s943_s19, 2  ;;  %s659_s20 = sand.u32 1, %s915_s12  }
 0x131   : > { %s660_s9 = scalar_lea.sflag [#allocation3], %s659_s20 }
 0x132   : > { %p775_p5 = pnand %p778_p4, %p1032_p8 }
 0x134   : > { %910 = dma.done.wait (!%p775_p5), %s660_s9, 256  }
 0x135   : > { %912 = vsyncadd (!%p775_p5), %s660_s9, 4294967040  ;;  %s16_s19 = sadd.s32 1, %s943_s19   ;;  %s1299_s12 = smov %s919_s13 }
 0x136   : > { %p13_p6 = scmp.ge.s32.totalorder %s16_s19, 6   ;;  %s1300_s13 = smov %s923_s14 }
 0x137   : > { %s1301_s14 = smov %s1041_s30  ;;  %s1302_s15 = smov %s935_s17 }
 0x138   : > { %s1303_s16 = smov %s939_s18  ;;  %s1304_s17 = smov %s1307_s22 }
 0x139   : > { %s1305_s18 = smov %s1311_s23  ;;  %15 = sbr.rel (!%p13_p6) target bundleno = 5 (0x5), region = 73 }
 0x140   :  { %665 = vsyncpa [#allocation3], 1 }
 0x141   :  { %667 = vsyncpa [#allocation3 + $0x1], 1 }

</bundles_post_ra>
